<compile_context>
chip_gen: v7x
topology: tpu7x:2x2x1
jax: 0.10.0
libtpu: 0.0.40
codegen_flags: <defaults>
</compile_context>

<pallas_src>
import functools

import jax
import jax.numpy as jnp
from jax.experimental import pallas as pl
from jax.experimental.pallas import tpu as pltpu


def _round_up(a, b):
    return (a + b - 1) // b * b


def _attwnn_kernel(TM, Np,
                   adj_ref, feat_ref, onehot_ref, wfc_ref, bfc_ref,
                   adjh_ref, z0_ref, ssum_ref, w1_ref, b1_ref, w2_ref, b2_ref,
                   out_ref,
                   x_scr, z_scr, zx_scr, tg_scr, hpre_scr):
    """One grid point = (random-walk step i, node-row block r).

    adj_ref    [TM, Np] bf16   row block r of padded adjacency (steps >= 1)
    feat_ref   [TM, F]  f32    row block r of node features (step 0 only)
    onehot_ref [TM, G]  f32    graph one-hot rows, pre-scaled by 1/counts
    adjh_ref   [HS, HS] f32    block-diagonal hidden-graph adjacency
    z0_ref     [HS, D]  f32    stacked hidden-graph features
    ssum_ref   [HS, H]  f32    within-hidden-graph row-sum matrix
    w1_ref     [1,H,P]  f32    step-i slab of BN-folded fc1 weight
    out_ref    [G, C]   f32    log-probs (written at the last grid point)

    scratch (persists across the grid):
      x_scr   [2*Np, D]  x_{i-1}/x_i double buffer (slot = step parity)
      z_scr   [HS, D]    current hidden-graph embedding z_i
      zx_scr  [Np, HS]   zx = x_0 z_0^T (node-major)
      tg_scr  [G, HS]    per-step graph aggregation accumulator
      hpre_scr [G, P]    accumulated (BN-folded) fc1 pre-activation
    """
    i = pl.program_id(0)            # random-walk step
    r = pl.program_id(1)            # node-row block
    last_step = pl.num_programs(0) - 1
    last_rb = pl.num_programs(1) - 1

    cur = jax.lax.rem(i, 2)         # slot holding x_i
    prev = 1 - cur                  # slot holding x_{i-1}
    start = pl.multiple_of(r * TM, 8)
    woff = pl.multiple_of(cur * Np + start, 8)
    roff = pl.multiple_of(prev * Np, 8)

    # ---- per-step state (once per step, at the first row block) ------------
    @pl.when(jnp.logical_and(i == 0, r == 0))
    def _init():
        z_scr[...] = z0_ref[...]
        hpre_scr[...] = jnp.zeros_like(hpre_scr)

    @pl.when(jnp.logical_and(i > 0, r == 0))
    def _z_update():
        z_scr[...] = jnp.dot(adjh_ref[...], z_scr[...],
                             preferred_element_type=jnp.float32)

    @pl.when(r == 0)
    def _tg_init():
        tg_scr[...] = jnp.zeros_like(tg_scr)

    # ---- node embedding rows for this block ---------------------------------
    @pl.when(i == 0)
    def _x_step0():
        xb0 = jax.nn.sigmoid(
            jnp.dot(feat_ref[...], wfc_ref[...],
                    preferred_element_type=jnp.float32) + bfc_ref[...])
        x_scr[pl.ds(woff, TM), :] = xb0

    @pl.when(i > 0)
    def _x_stepk():
        # adj (bf16, exact 0/1) @ x_{i-1} (bf16 operand, f32 accumulate)
        xprev = x_scr[pl.ds(roff, Np), :].astype(jnp.bfloat16)
        xbk = jnp.dot(adj_ref[...], xprev, preferred_element_type=jnp.float32)
        x_scr[pl.ds(woff, TM), :] = xbk

    xb = x_scr[pl.ds(woff, TM), :]                                    # [TM, D]

    # t[n, hs] = sum_d x[n, d] * z[hs, d]
    tb = jax.lax.dot_general(xb, z_scr[...], (((1,), (1,)), ((), ())),
                             preferred_element_type=jnp.float32)      # [TM, HS]

    @pl.when(i == 0)
    def _zx_store():
        zx_scr[pl.ds(start, TM), :] = tb

    zxb = zx_scr[pl.ds(start, TM), :]                                 # [TM, HS]
    th = zxb * tb                                                     # dropout=id

    # tg[g, hs] += sum_n onehot_scaled[n, g] * th[n, hs]
    tg_scr[...] += jax.lax.dot_general(onehot_ref[...], th,
                                       (((0,), (0,)), ((), ())),
                                       preferred_element_type=jnp.float32)

    # ---- per-step finalize: fold this step's [G, H] into fc1 pre-activation -
    @pl.when(r == last_rb)
    def _step_tail():
        g = jnp.dot(tg_scr[...], ssum_ref[...],
                    preferred_element_type=jnp.float32)               # [G, H]
        hpre_scr[...] += jnp.dot(g, w1_ref[0],
                                 preferred_element_type=jnp.float32)  # [G, P]

    # ---- head on the very last grid point ------------------------------------
    @pl.when(jnp.logical_and(i == last_step, r == last_rb))
    def _head():
        h = jnp.maximum(hpre_scr[...] + b1_ref[...], 0.0)
        logits = (jnp.dot(h, w2_ref[...], preferred_element_type=jnp.float32)
                  + b2_ref[...])
        m = jnp.max(logits, axis=1, keepdims=True)
        lse = jnp.log(jnp.sum(jnp.exp(logits - m), axis=1, keepdims=True)) + m
        out_ref[...] = logits - lse


def attwnn_forward(adj, features, graph_indicator, params, *, max_step,
                   hidden_graphs, size_hidden_graphs, n_graphs,
                   normalize=True, block_rows=512):
    N, F = features.shape
    H, S = hidden_graphs, size_hidden_graphs
    HS = H * S
    D = params['features_hidden'].shape[-1]
    G = n_graphs
    P = params['w1'].shape[1]
    C = params['w2'].shape[1]

    # Node-row tiling (pad N up to a multiple of the row-block size).
    TM = int(min(_round_up(block_rows, 8), _round_up(N, 8)))
    Np = _round_up(N, TM)
    NB = Np // TM
    pad = Np - N

    # TODO(synk): on v5e/v6e an int8 adjacency (0/1 is exact) would quarter the
    #             streamed bytes; v7x's MXU has no integer path, so bf16 is kept
    #             as the portable choice here.
    adj_p = jnp.pad(adj.astype(jnp.float32),
                    ((0, pad), (0, pad))).astype(jnp.bfloat16)
    feat_p = jnp.pad(features.astype(jnp.float32), ((0, pad), (0, 0)))

    onehot = jax.nn.one_hot(graph_indicator, G, dtype=jnp.float32)     # [N, G]
    counts = jnp.maximum(jnp.sum(onehot, axis=0), 1.0)                 # [G]
    if normalize:
        onehot = onehot / counts[None, :]          # fold 1/counts into aggregation
    onehot_p = jnp.pad(onehot, ((0, pad), (0, 0)))

    # Symmetric hidden adjacency laid out as one block-diagonal [HS, HS] matrix.
    iu, ju = jnp.triu_indices(S, k=1)
    A = jnp.zeros((H, S, S), jnp.float32).at[:, iu, ju].set(
        jax.nn.relu(params['adj_hidden']))
    A = A + jnp.swapaxes(A, 1, 2)
    hh = jnp.arange(H)
    adjh = (jnp.zeros((H, S, H, S), jnp.float32)
            .at[hh, :, hh, :].set(A).reshape(HS, HS))

    z0 = params['features_hidden'].reshape(HS, D).astype(jnp.float32)
    ssum = jnp.repeat(jnp.eye(H, dtype=jnp.float32), S, axis=0)        # [HS, H]

    # Fold BatchNorm (eval, running stats) into fc1.
    eps = 1e-5
    bn_scale = params['bn_gamma'] / jnp.sqrt(params['bn_var'] + eps)   # [H*M]
    bn_bias = params['bn_beta'] - params['bn_mean'] * bn_scale
    w1_eff = (bn_scale[:, None] * params['w1']).reshape(
        max_step, H, P).astype(jnp.float32)
    b1_eff = (params['b1'] + bn_bias @ params['w1']).reshape(1, P).astype(
        jnp.float32)

    inputs = (adj_p, feat_p, onehot_p,
              params['w_fc'].astype(jnp.float32),
              params['b_fc'].reshape(1, D).astype(jnp.float32),
              adjh, z0, ssum, w1_eff, b1_eff,
              params['w2'].astype(jnp.float32),
              params['b2'].reshape(1, C).astype(jnp.float32))

    in_specs = [
        # adjacency row block; only used for steps >= 1 (step 0 pins block 0 so
        # no wasted adj pass is streamed for the "eye" step).
        pl.BlockSpec((TM, Np), lambda i, r: (jnp.where(i > 0, r, 0), 0)),
        # feature row block; only used at step 0.
        pl.BlockSpec((TM, F), lambda i, r: (jnp.where(i == 0, r, 0), 0)),
        pl.BlockSpec((TM, G), lambda i, r: (r, 0)),
        pl.BlockSpec((F, D), lambda i, r: (0, 0)),
        pl.BlockSpec((1, D), lambda i, r: (0, 0)),
        pl.BlockSpec((HS, HS), lambda i, r: (0, 0)),
        pl.BlockSpec((HS, D), lambda i, r: (0, 0)),
        pl.BlockSpec((HS, H), lambda i, r: (0, 0)),
        pl.BlockSpec((1, H, P), lambda i, r: (i, 0, 0)),   # fc1 slab for step i
        pl.BlockSpec((1, P), lambda i, r: (0, 0)),
        pl.BlockSpec((P, C), lambda i, r: (0, 0)),
        pl.BlockSpec((1, C), lambda i, r: (0, 0)),
    ]
    out_spec = pl.BlockSpec((G, C), lambda i, r: (0, 0))

    scratch_shapes = [
        pltpu.VMEM((2 * Np, D), jnp.float32),   # x_{i-1}/x_i double buffer
        pltpu.VMEM((HS, D), jnp.float32),       # z_i
        pltpu.VMEM((Np, HS), jnp.float32),      # zx
        pltpu.VMEM((G, HS), jnp.float32),       # per-step graph accumulator
        pltpu.VMEM((G, P), jnp.float32),        # fc1 pre-activation accumulator
    ]

    # Generation-aware VMEM budget (<= ~80% of physical capacity; no 96 MiB clamp).
    try:
        vmem_cap = int(pltpu.get_tpu_info().vmem_capacity_bytes)
    except Exception:  # conservative fallback (v7x per-core size)
        vmem_cap = 64 << 20
    blk_bytes = TM * Np * 2 + TM * F * 4 + TM * G * 4
    scr_bytes = 4 * (2 * Np * D + HS * D + Np * HS + G * HS + G * P)
    param_bytes = sum(int(a.size) * a.dtype.itemsize for a in inputs[3:])
    resident = 2 * blk_bytes + scr_bytes + param_bytes
    vmem_limit = int(min(0.8 * vmem_cap, max(32 << 20, 4 * resident)))

    flops = int(2 * Np * F * D
                + (max_step - 1) * 2 * Np * Np * D
                + (max_step - 1) * 2 * HS * HS * D
                + max_step * 2 * Np * HS * D
                + max_step * 2 * Np * G * HS
                + max_step * 2 * G * HS * H
                + max_step * 2 * G * H * P
                + 2 * G * P * C)
    transcendentals = int(Np * D + 2 * G * C)
    bytes_accessed = int((max_step - 1) * Np * Np * 2 + TM * Np * 2
                         + Np * F * 4 + max_step * Np * G * 4
                         + param_bytes + G * C * 4)

    kernel = functools.partial(_attwnn_kernel, TM, Np)
    logp = pl.pallas_call(
        kernel,
        out_shape=jax.ShapeDtypeStruct((G, C), jnp.float32),
        grid=(max_step, NB),
        in_specs=in_specs,
        out_specs=out_spec,
        scratch_shapes=scratch_shapes,
        compiler_params=pltpu.CompilerParams(
            # TODO(synk): on v7x the row-block axis could be split across the two
            # TensorCores ("parallel") with a per-step exchange of the x halves;
            # kept "arbitrary" because x_{i-1} is a cross-block carry.
            dimension_semantics=("arbitrary", "arbitrary"),
            vmem_limit_bytes=vmem_limit),
        cost_estimate=pl.CostEstimate(flops=flops,
                                      transcendentals=transcendentals,
                                      bytes_accessed=bytes_accessed),
    )(*inputs)
    return logp


def attwnn_reference(adj, features, graph_indicator, params, *, max_step,
                     hidden_graphs, size_hidden_graphs, n_graphs,
                     normalize=True):
    """Pure-JAX mirror of the PyTorch forward (eval mode).

    Mirrors the kernel's precision choice: adj @ x uses bf16 operands with f32
    accumulation (adj entries are 0/1, exact in bf16); everything else is f32.
    """
    H, S = hidden_graphs, size_hidden_graphs
    iu, ju = jnp.triu_indices(S, k=1)
    A = jnp.zeros((H, S, S), jnp.float32).at[:, iu, ju].set(
        jax.nn.relu(params['adj_hidden']))
    A = A + jnp.swapaxes(A, 1, 2)
    onehot = jax.nn.one_hot(graph_indicator, n_graphs, dtype=jnp.float32)
    counts = jnp.maximum(jnp.sum(onehot, axis=0), 1.0)
    adj_bf = adj.astype(jnp.bfloat16)

    x = jax.nn.sigmoid(features @ params['w_fc'] + params['b_fc'])
    z = params['features_hidden']
    zx = jnp.einsum('hsd,nd->hsn', z, x)
    outs = []
    for i in range(max_step):
        if i == 0:
            t = zx
        else:
            x = jnp.dot(adj_bf, x.astype(jnp.bfloat16),
                        preferred_element_type=jnp.float32)
            z = jnp.einsum('hst,htd->hsd', A, z)
            t = jnp.einsum('hsd,nd->hsn', z, x)
        t = zx * t
        t = jnp.einsum('hsn,ng->hsg', t, onehot)
        t = jnp.sum(t, axis=1).T                                      # [G, H]
        if normalize:
            t = t / counts[:, None]
        outs.append(t)
    out = jnp.concatenate(outs, axis=1)
    eps = 1e-5
    out = ((out - params['bn_mean']) / jnp.sqrt(params['bn_var'] + eps)
           * params['bn_gamma'] + params['bn_beta'])
    out = jax.nn.relu(out @ params['w1'] + params['b1'])
    out = out @ params['w2'] + params['b2']
    return jax.nn.log_softmax(out, axis=1)


if __name__ == "__main__":
    key = jax.random.PRNGKey(0)
    ks = jax.random.split(key, 14)

    # Small shapes consistent with the module.
    N, F, D = 256, 16, 32          # n_nodes, input_dim, hidden_dim
    H, S = 4, 8                    # hidden_graphs, size_hidden_graphs
    max_step = 3
    G = 8                          # n_graphs
    P, C = 16, 5                   # penultimate_dim, n_classes

    a = jax.random.uniform(ks[0], (N, N))
    adj = ((a + a.T) > 1.8).astype(jnp.float32)                  # sparse 0/1 graph
    features = 0.5 * jax.random.normal(ks[1], (N, F), jnp.float32)
    graph_indicator = jnp.repeat(jnp.arange(G, dtype=jnp.int32), N // G)

    params = {
        'adj_hidden': jax.random.uniform(ks[2], (H, S * (S - 1) // 2),
                                         minval=-1.0, maxval=1.0),
        'features_hidden': 0.1 * jax.random.uniform(ks[3], (H, S, D)),
        'w_fc': 0.1 * jax.random.normal(ks[4], (F, D)),
        'b_fc': 0.1 * jax.random.normal(ks[5], (D,)),
        'bn_gamma': 1.0 + 0.1 * jax.random.normal(ks[6], (H * max_step,)),
        'bn_beta': 0.1 * jax.random.normal(ks[7], (H * max_step,)),
        'bn_mean': 0.1 * jax.random.normal(ks[8], (H * max_step,)),
        'bn_var': 1.0 + jax.random.uniform(ks[9], (H * max_step,)),
        'w1': 0.02 * jax.random.normal(ks[10], (H * max_step, P)),
        'b1': 0.1 * jax.random.normal(ks[11], (P,)),
        'w2': 0.02 * jax.random.normal(ks[12], (P, C)),
        'b2': 0.1 * jax.random.normal(ks[13], (C,)),
    }

    out = attwnn_forward(adj, features, graph_indicator, params,
                         max_step=max_step, hidden_graphs=H,
                         size_hidden_graphs=S, n_graphs=G,
                         normalize=True, block_rows=128)   # 2 node-row blocks
    out = jax.block_until_ready(out)

    ref = attwnn_reference(adj, features, graph_indicator, params,
                           max_step=max_step, hidden_graphs=H,
                           size_hidden_graphs=S, n_graphs=G, normalize=True)
    assert out.shape == (G, C)
    assert bool(jnp.all(jnp.isfinite(out)))
    assert jnp.allclose(out, ref, atol=5e-3, rtol=5e-3), (
        f"max abs diff {jnp.max(jnp.abs(out - ref))}")
    print("KERNEL_OK")
</pallas_src>

<mosaic_0001>
module attributes {stable_mosaic.version = 11 : i64} {
  func.func @_attwnn_kernel(%arg0: i32, %arg1: i32, %arg2: memref<128x256xbf16, #tpu.memory_space<vmem>>, %arg3: memref<128x16xf32, #tpu.memory_space<vmem>>, %arg4: memref<128x8xf32, #tpu.memory_space<vmem>>, %arg5: memref<16x32xf32, #tpu.memory_space<vmem>>, %arg6: memref<1x32xf32, #tpu.memory_space<vmem>>, %arg7: memref<32x32xf32, #tpu.memory_space<vmem>>, %arg8: memref<32x32xf32, #tpu.memory_space<vmem>>, %arg9: memref<32x4xf32, #tpu.memory_space<vmem>>, %arg10: memref<1x4x16xf32, #tpu.memory_space<vmem>>, %arg11: memref<1x16xf32, #tpu.memory_space<vmem>>, %arg12: memref<16x5xf32, #tpu.memory_space<vmem>>, %arg13: memref<1x5xf32, #tpu.memory_space<vmem>>, %arg14: memref<8x5xf32, #tpu.memory_space<vmem>>, %arg15: memref<512x32xf32, #tpu.memory_space<vmem>>, %arg16: memref<32x32xf32, #tpu.memory_space<vmem>>, %arg17: memref<256x32xf32, #tpu.memory_space<vmem>>, %arg18: memref<8x32xf32, #tpu.memory_space<vmem>>, %arg19: memref<8x16xf32, #tpu.memory_space<vmem>>) attributes {dimension_semantics = [#tpu.dimension_semantics<arbitrary>, #tpu.dimension_semantics<arbitrary>], iteration_bounds = array<i64: 3, 2>, scalar_prefetch = 0 : i64, scratch_operands = 5 : i64, tpu.core_type = #tpu.core_type<tc>, window_params = [{transform_indices = @transform_0, window_bounds = array<i64: 128, 256>}, {transform_indices = @transform_1, window_bounds = array<i64: 128, 16>}, {transform_indices = @transform_2, window_bounds = array<i64: 128, 8>}, {pipeline_mode = #tpu.pipeline_mode<synchronous>, transform_indices = @transform_3, window_bounds = array<i64: 16, 32>}, {pipeline_mode = #tpu.pipeline_mode<synchronous>, transform_indices = @transform_4, window_bounds = array<i64: 1, 32>}, {pipeline_mode = #tpu.pipeline_mode<synchronous>, transform_indices = @transform_5, window_bounds = array<i64: 32, 32>}, {pipeline_mode = #tpu.pipeline_mode<synchronous>, transform_indices = @transform_6, window_bounds = array<i64: 32, 32>}, {pipeline_mode = #tpu.pipeline_mode<synchronous>, transform_indices = @transform_7, window_bounds = array<i64: 32, 4>}, {transform_indices = @transform_8, window_bounds = array<i64: 1, 4, 16>}, {pipeline_mode = #tpu.pipeline_mode<synchronous>, transform_indices = @transform_9, window_bounds = array<i64: 1, 16>}, {pipeline_mode = #tpu.pipeline_mode<synchronous>, transform_indices = @transform_10, window_bounds = array<i64: 16, 5>}, {pipeline_mode = #tpu.pipeline_mode<synchronous>, transform_indices = @transform_11, window_bounds = array<i64: 1, 5>}, {pipeline_mode = #tpu.pipeline_mode<synchronous>, transform_indices = @transform_12, window_bounds = array<i64: 8, 5>}]} {
    %c2_i32 = arith.constant 2 : i32
    %0 = arith.remsi %arg0, %c2_i32 : i32
    %c1_i32 = arith.constant 1 : i32
    %1 = arith.subi %c1_i32, %0 : i32
    %c128_i32 = arith.constant 128 : i32
    %2 = arith.muli %arg1, %c128_i32 : i32
    %3 = tpu.assume_multiple %2, 8 : i32
    %c256_i32 = arith.constant 256 : i32
    %4 = arith.muli %0, %c256_i32 : i32
    %5 = arith.addi %4, %3 : i32
    %6 = tpu.assume_multiple %5, 8 : i32
    %c256_i32_0 = arith.constant 256 : i32
    %7 = arith.muli %1, %c256_i32_0 : i32
    %8 = tpu.assume_multiple %7, 8 : i32
    %c0_i32 = arith.constant 0 : i32
    %9 = arith.cmpi eq, %arg0, %c0_i32 : i32
    %c0_i32_1 = arith.constant 0 : i32
    %10 = arith.cmpi eq, %arg1, %c0_i32_1 : i32
    %11 = arith.andi %9, %10 : i1
    %12 = arith.extui %11 : i1 to i32
    %c0_i32_2 = arith.constant 0 : i32
    %13 = arith.cmpi ne, %12, %c0_i32_2 : i32
    scf.if %13 {
      %c0_29 = arith.constant 0 : index
      %c0_30 = arith.constant 0 : index
      %51 = vector.load %arg8[%c0_29, %c0_30] : memref<32x32xf32, #tpu.memory_space<vmem>>, vector<32x32xf32>
      %c0_31 = arith.constant 0 : index
      %c0_32 = arith.constant 0 : index
      %52 = vector.load %arg16[%c0_31, %c0_32] : memref<32x32xf32, #tpu.memory_space<vmem>>, vector<32x32xf32>
      tpu.vector_store %arg16[%c0_31, %c0_32], %51 {strides = array<i32>} : memref<32x32xf32, #tpu.memory_space<vmem>>, vector<32x32xf32>,
      %cst_33 = arith.constant 0.000000e+00 : f32
      %53 = vector.broadcast %cst_33 : f32 to vector<8x16xf32>
      %c0_34 = arith.constant 0 : index
      %c0_35 = arith.constant 0 : index
      %54 = vector.load %arg19[%c0_34, %c0_35] : memref<8x16xf32, #tpu.memory_space<vmem>>, vector<8x16xf32>
      tpu.vector_store %arg19[%c0_34, %c0_35], %53 {strides = array<i32>} : memref<8x16xf32, #tpu.memory_space<vmem>>, vector<8x16xf32>,
    } else {
    }
    %c0_i32_3 = arith.constant 0 : i32
    %14 = arith.cmpi sgt, %arg0, %c0_i32_3 : i32
    %c0_i32_4 = arith.constant 0 : i32
    %15 = arith.cmpi eq, %arg1, %c0_i32_4 : i32
    %16 = arith.andi %14, %15 : i1
    %17 = arith.extui %16 : i1 to i32
    %c0_i32_5 = arith.constant 0 : i32
    %18 = arith.cmpi ne, %17, %c0_i32_5 : i32
    scf.if %18 {
      %c0_29 = arith.constant 0 : index
      %c0_30 = arith.constant 0 : index
      %51 = vector.load %arg7[%c0_29, %c0_30] : memref<32x32xf32, #tpu.memory_space<vmem>>, vector<32x32xf32>
      %c0_31 = arith.constant 0 : index
      %c0_32 = arith.constant 0 : index
      %52 = vector.load %arg16[%c0_31, %c0_32] : memref<32x32xf32, #tpu.memory_space<vmem>>, vector<32x32xf32>
      %cst_33 = arith.constant dense<0.000000e+00> : vector<32x32xf32>
      %53 = tpu.matmul %51, %52, %cst_33 {dimension_numbers = #tpu.dot_dimension_numbers<[1], [0], [0], [1], [0, 0, 1, 1], [], []>} : vector<32x32xf32>, vector<32x32xf32>, vector<32x32xf32> -> vector<32x32xf32>
      %c0_34 = arith.constant 0 : index
      %c0_35 = arith.constant 0 : index
      %54 = vector.load %arg16[%c0_34, %c0_35] : memref<32x32xf32, #tpu.memory_space<vmem>>, vector<32x32xf32>
      tpu.vector_store %arg16[%c0_34, %c0_35], %53 {strides = array<i32>} : memref<32x32xf32, #tpu.memory_space<vmem>>, vector<32x32xf32>,
    } else {
    }
    %c0_i32_6 = arith.constant 0 : i32
    %19 = arith.cmpi eq, %arg1, %c0_i32_6 : i32
    %20 = arith.extui %19 : i1 to i32
    %c0_i32_7 = arith.constant 0 : i32
    %21 = arith.cmpi ne, %20, %c0_i32_7 : i32
    scf.if %21 {
      %cst_29 = arith.constant 0.000000e+00 : f32
      %51 = vector.broadcast %cst_29 : f32 to vector<8x32xf32>
      %c0_30 = arith.constant 0 : index
      %c0_31 = arith.constant 0 : index
      %52 = vector.load %arg18[%c0_30, %c0_31] : memref<8x32xf32, #tpu.memory_space<vmem>>, vector<8x32xf32>
      tpu.vector_store %arg18[%c0_30, %c0_31], %51 {strides = array<i32>} : memref<8x32xf32, #tpu.memory_space<vmem>>, vector<8x32xf32>,
    } else {
    }
    %c0_i32_8 = arith.constant 0 : i32
    %22 = arith.cmpi eq, %arg0, %c0_i32_8 : i32
    %23 = arith.extui %22 : i1 to i32
    %c0_i32_9 = arith.constant 0 : i32
    %24 = arith.cmpi ne, %23, %c0_i32_9 : i32
    scf.if %24 {
      %c0_29 = arith.constant 0 : index
      %c0_30 = arith.constant 0 : index
      %51 = vector.load %arg3[%c0_29, %c0_30] : memref<128x16xf32, #tpu.memory_space<vmem>>, vector<128x16xf32>
      %c0_31 = arith.constant 0 : index
      %c0_32 = arith.constant 0 : index
      %52 = vector.load %arg5[%c0_31, %c0_32] : memref<16x32xf32, #tpu.memory_space<vmem>>, vector<16x32xf32>
      %cst_33 = arith.constant dense<0.000000e+00> : vector<128x32xf32>
      %53 = tpu.matmul %51, %52, %cst_33 {dimension_numbers = #tpu.dot_dimension_numbers<[1], [0], [0], [1], [0, 0, 1, 1], [], []>} : vector<128x16xf32>, vector<16x32xf32>, vector<128x32xf32> -> vector<128x32xf32>
      %c0_34 = arith.constant 0 : index
      %c0_35 = arith.constant 0 : index
      %54 = vector.load %arg6[%c0_34, %c0_35] : memref<1x32xf32, #tpu.memory_space<vmem>>, vector<1x32xf32>
      %55 = vector.broadcast %54 : vector<1x32xf32> to vector<128x32xf32>
      %56 = arith.addf %53, %55 : vector<128x32xf32>
      %57 = arith.negf %56 : vector<128x32xf32>
      %58 = math.exp %57 : vector<128x32xf32>
      %cst_36 = arith.constant 1.000000e+00 : f32
      %59 = vector.broadcast %cst_36 : f32 to vector<128x32xf32>
      %60 = arith.addf %59, %58 : vector<128x32xf32>
      %61 = arith.divf %59, %60 : vector<128x32xf32>
      %62 = arith.index_cast %6 : i32 to index
      %c0_37 = arith.constant 0 : index
      %63 = vector.load %arg15[%62, %c0_37] : memref<512x32xf32, #tpu.memory_space<vmem>>, vector<128x32xf32>
      tpu.vector_store %arg15[%62, %c0_37], %61 {strides = array<i32>} : memref<512x32xf32, #tpu.memory_space<vmem>>, vector<128x32xf32>,
    } else {
    }
    %c0_i32_10 = arith.constant 0 : i32
    %25 = arith.cmpi sgt, %arg0, %c0_i32_10 : i32
    %26 = arith.extui %25 : i1 to i32
    %c0_i32_11 = arith.constant 0 : i32
    %27 = arith.cmpi ne, %26, %c0_i32_11 : i32
    scf.if %27 {
      %51 = arith.index_cast %8 : i32 to index
      %c0_29 = arith.constant 0 : index
      %52 = vector.load %arg15[%51, %c0_29] : memref<512x32xf32, #tpu.memory_space<vmem>>, vector<256x32xf32>
      %53 = arith.truncf %52 : vector<256x32xf32> to vector<256x32xbf16>
      %c0_30 = arith.constant 0 : index
      %c0_31 = arith.constant 0 : index
      %54 = vector.load %arg2[%c0_30, %c0_31] : memref<128x256xbf16, #tpu.memory_space<vmem>>, vector<128x256xbf16>
      %cst_32 = arith.constant dense<0.000000e+00> : vector<128x32xf32>
      %55 = tpu.matmul %54, %53, %cst_32 {dimension_numbers = #tpu.dot_dimension_numbers<[1], [0], [0], [1], [0, 0, 1, 1], [], []>} : vector<128x256xbf16>, vector<256x32xbf16>, vector<128x32xf32> -> vector<128x32xf32>
      %56 = arith.index_cast %6 : i32 to index
      %c0_33 = arith.constant 0 : index
      %57 = vector.load %arg15[%56, %c0_33] : memref<512x32xf32, #tpu.memory_space<vmem>>, vector<128x32xf32>
      tpu.vector_store %arg15[%56, %c0_33], %55 {strides = array<i32>} : memref<512x32xf32, #tpu.memory_space<vmem>>, vector<128x32xf32>,
    } else {
    }
    %28 = arith.index_cast %6 : i32 to index
    %c0 = arith.constant 0 : index
    %29 = vector.load %arg15[%28, %c0] : memref<512x32xf32, #tpu.memory_space<vmem>>, vector<128x32xf32>
    %c0_12 = arith.constant 0 : index
    %c0_13 = arith.constant 0 : index
    %30 = vector.load %arg16[%c0_12, %c0_13] : memref<32x32xf32, #tpu.memory_space<vmem>>, vector<32x32xf32>
    %cst = arith.constant dense<0.000000e+00> : vector<128x32xf32>
    %31 = tpu.matmul %29, %30, %cst {dimension_numbers = #tpu.dot_dimension_numbers<[1], [1], [0], [0], [0, 0, 1, 0], [], []>} : vector<128x32xf32>, vector<32x32xf32>, vector<128x32xf32> -> vector<128x32xf32>
    %c0_i32_14 = arith.constant 0 : i32
    %32 = arith.cmpi eq, %arg0, %c0_i32_14 : i32
    %33 = arith.extui %32 : i1 to i32
    %c0_i32_15 = arith.constant 0 : i32
    %34 = arith.cmpi ne, %33, %c0_i32_15 : i32
    scf.if %34 {
      %51 = arith.index_cast %3 : i32 to index
      %c0_29 = arith.constant 0 : index
      %52 = vector.load %arg17[%51, %c0_29] : memref<256x32xf32, #tpu.memory_space<vmem>>, vector<128x32xf32>
      tpu.vector_store %arg17[%51, %c0_29], %31 {strides = array<i32>} : memref<256x32xf32, #tpu.memory_space<vmem>>, vector<128x32xf32>,
    } else {
    }
    %35 = arith.index_cast %3 : i32 to index
    %c0_16 = arith.constant 0 : index
    %36 = vector.load %arg17[%35, %c0_16] : memref<256x32xf32, #tpu.memory_space<vmem>>, vector<128x32xf32>
    %37 = arith.mulf %36, %31 : vector<128x32xf32>
    %c0_17 = arith.constant 0 : index
    %c0_18 = arith.constant 0 : index
    %38 = vector.load %arg18[%c0_17, %c0_18] : memref<8x32xf32, #tpu.memory_space<vmem>>, vector<8x32xf32>
    %c0_19 = arith.constant 0 : index
    %c0_20 = arith.constant 0 : index
    %39 = vector.load %arg4[%c0_19, %c0_20] : memref<128x8xf32, #tpu.memory_space<vmem>>, vector<128x8xf32>
    %cst_21 = arith.constant dense<0.000000e+00> : vector<8x32xf32>
    %40 = tpu.matmul %39, %37, %cst_21 {dimension_numbers = #tpu.dot_dimension_numbers<[0], [0], [1], [1], [0, 1, 1, 1], [], []>} : vector<128x8xf32>, vector<128x32xf32>, vector<8x32xf32> -> vector<8x32xf32>
    %41 = arith.addf %38, %40 : vector<8x32xf32>
    %c0_22 = arith.constant 0 : index
    %c0_23 = arith.constant 0 : index
    %42 = vector.load %arg18[%c0_22, %c0_23] : memref<8x32xf32, #tpu.memory_space<vmem>>, vector<8x32xf32>
    tpu.vector_store %arg18[%c0_22, %c0_23], %41 {strides = array<i32>} : memref<8x32xf32, #tpu.memory_space<vmem>>, vector<8x32xf32>,
    %c1_i32_24 = arith.constant 1 : i32
    %43 = arith.cmpi eq, %arg1, %c1_i32_24 : i32
    %44 = arith.extui %43 : i1 to i32
    %c0_i32_25 = arith.constant 0 : i32
    %45 = arith.cmpi ne, %44, %c0_i32_25 : i32
    scf.if %45 {
      %c0_29 = arith.constant 0 : index
      %c0_30 = arith.constant 0 : index
      %51 = vector.load %arg18[%c0_29, %c0_30] : memref<8x32xf32, #tpu.memory_space<vmem>>, vector<8x32xf32>
      %c0_31 = arith.constant 0 : index
      %c0_32 = arith.constant 0 : index
      %52 = vector.load %arg9[%c0_31, %c0_32] : memref<32x4xf32, #tpu.memory_space<vmem>>, vector<32x4xf32>
      %cst_33 = arith.constant dense<0.000000e+00> : vector<8x4xf32>
      %53 = tpu.matmul %51, %52, %cst_33 {dimension_numbers = #tpu.dot_dimension_numbers<[1], [0], [0], [1], [0, 0, 1, 1], [], []>} : vector<8x32xf32>, vector<32x4xf32>, vector<8x4xf32> -> vector<8x4xf32>
      %c0_34 = arith.constant 0 : index
      %c0_35 = arith.constant 0 : index
      %54 = vector.load %arg19[%c0_34, %c0_35] : memref<8x16xf32, #tpu.memory_space<vmem>>, vector<8x16xf32>
      %c0_36 = arith.constant 0 : index
      %c0_37 = arith.constant 0 : index
      %c0_38 = arith.constant 0 : index
      %55 = vector.load %arg10[%c0_36, %c0_37, %c0_38] : memref<1x4x16xf32, #tpu.memory_space<vmem>>, vector<1x4x16xf32>
      %56 = vector.shape_cast %55 : vector<1x4x16xf32> to vector<4x16xf32>
      %cst_39 = arith.constant dense<0.000000e+00> : vector<8x16xf32>
      %57 = tpu.matmul %53, %56, %cst_39 {dimension_numbers = #tpu.dot_dimension_numbers<[1], [0], [0], [1], [0, 0, 1, 1], [], []>} : vector<8x4xf32>, vector<4x16xf32>, vector<8x16xf32> -> vector<8x16xf32>
      %58 = arith.addf %54, %57 : vector<8x16xf32>
      %c0_40 = arith.constant 0 : index
      %c0_41 = arith.constant 0 : index
      %59 = vector.load %arg19[%c0_40, %c0_41] : memref<8x16xf32, #tpu.memory_space<vmem>>, vector<8x16xf32>
      tpu.vector_store %arg19[%c0_40, %c0_41], %58 {strides = array<i32>} : memref<8x16xf32, #tpu.memory_space<vmem>>, vector<8x16xf32>,
    } else {
    }
    %c2_i32_26 = arith.constant 2 : i32
    %46 = arith.cmpi eq, %arg0, %c2_i32_26 : i32
    %c1_i32_27 = arith.constant 1 : i32
    %47 = arith.cmpi eq, %arg1, %c1_i32_27 : i32
    %48 = arith.andi %46, %47 : i1
    %49 = arith.extui %48 : i1 to i32
    %c0_i32_28 = arith.constant 0 : i32
    %50 = arith.cmpi ne, %49, %c0_i32_28 : i32
    scf.if %50 {
      %c0_29 = arith.constant 0 : index
      %c0_30 = arith.constant 0 : index
      %51 = vector.load %arg19[%c0_29, %c0_30] : memref<8x16xf32, #tpu.memory_space<vmem>>, vector<8x16xf32>
      %c0_31 = arith.constant 0 : index
      %c0_32 = arith.constant 0 : index
      %52 = vector.load %arg11[%c0_31, %c0_32] : memref<1x16xf32, #tpu.memory_space<vmem>>, vector<1x16xf32>
      %53 = vector.broadcast %52 : vector<1x16xf32> to vector<8x16xf32>
      %54 = arith.addf %51, %53 : vector<8x16xf32>
      %cst_33 = arith.constant 0.000000e+00 : f32
      %55 = vector.broadcast %cst_33 : f32 to vector<8x16xf32>
      %56 = arith.maximumf %54, %55 : vector<8x16xf32>
      %c0_34 = arith.constant 0 : index
      %c0_35 = arith.constant 0 : index
      %57 = vector.load %arg12[%c0_34, %c0_35] : memref<16x5xf32, #tpu.memory_space<vmem>>, vector<16x5xf32>
      %cst_36 = arith.constant dense<0.000000e+00> : vector<8x5xf32>
      %58 = tpu.matmul %56, %57, %cst_36 {dimension_numbers = #tpu.dot_dimension_numbers<[1], [0], [0], [1], [0, 0, 1, 1], [], []>} : vector<8x16xf32>, vector<16x5xf32>, vector<8x5xf32> -> vector<8x5xf32>
      %c0_37 = arith.constant 0 : index
      %c0_38 = arith.constant 0 : index
      %59 = vector.load %arg13[%c0_37, %c0_38] : memref<1x5xf32, #tpu.memory_space<vmem>>, vector<1x5xf32>
      %60 = vector.broadcast %59 : vector<1x5xf32> to vector<8x5xf32>
      %61 = arith.addf %58, %60 : vector<8x5xf32>
      %cst_39 = arith.constant dense<0xFF800000> : vector<8xf32>
      %62 = vector.multi_reduction <maximumf>, %61, %cst_39 [1] : vector<8x5xf32> to vector<8xf32>
      %63 = vector.shape_cast %62 : vector<8xf32> to vector<8x1xf32>
      %64 = vector.broadcast %63 : vector<8x1xf32> to vector<8x5xf32>
      %65 = arith.subf %61, %64 : vector<8x5xf32>
      %66 = math.exp %65 : vector<8x5xf32>
      %cst_40 = arith.constant dense<0.000000e+00> : vector<8xf32>
      %67 = vector.multi_reduction <add>, %66, %cst_40 [1] : vector<8x5xf32> to vector<8xf32>
      %68 = vector.shape_cast %67 : vector<8xf32> to vector<8x1xf32>
      %69 = math.log %68 : vector<8x1xf32>
      %70 = arith.addf %69, %63 : vector<8x1xf32>
      %71 = vector.broadcast %70 : vector<8x1xf32> to vector<8x5xf32>
      %72 = arith.subf %61, %71 : vector<8x5xf32>
      %c0_41 = arith.constant 0 : index
      %c0_42 = arith.constant 0 : index
      %73 = vector.load %arg14[%c0_41, %c0_42] : memref<8x5xf32, #tpu.memory_space<vmem>>, vector<8x5xf32>
      tpu.vector_store %arg14[%c0_41, %c0_42], %72 {strides = array<i32>} : memref<8x5xf32, #tpu.memory_space<vmem>>, vector<8x5xf32>,
    } else {
    }
    return
  }
  func.func @transform_0(%arg0: i32, %arg1: i32) -> (i32, i32) {
    %c0_i32 = arith.constant 0 : i32
    %0 = arith.cmpi sgt, %arg0, %c0_i32 : i32
    %c0_i32_0 = arith.constant 0 : i32
    %1 = arith.select %0, %arg1, %c0_i32_0 : i32
    %c0_i32_1 = arith.constant 0 : i32
    %c0_i32_2 = arith.constant 0 : i32
    return %1, %c0_i32_1 : i32, i32
  }
  func.func @transform_1(%arg0: i32, %arg1: i32) -> (i32, i32) {
    %c0_i32 = arith.constant 0 : i32
    %0 = arith.cmpi eq, %arg0, %c0_i32 : i32
    %c0_i32_0 = arith.constant 0 : i32
    %1 = arith.select %0, %arg1, %c0_i32_0 : i32
    %c0_i32_1 = arith.constant 0 : i32
    %c0_i32_2 = arith.constant 0 : i32
    return %1, %c0_i32_1 : i32, i32
  }
  func.func @transform_2(%arg0: i32, %arg1: i32) -> (i32, i32) {
    %c0_i32 = arith.constant 0 : i32
    %c0_i32_0 = arith.constant 0 : i32
    return %arg1, %c0_i32 : i32, i32
  }
  func.func @transform_3(%arg0: i32, %arg1: i32) -> (i32, i32) {
    %c0_i32 = arith.constant 0 : i32
    %c0_i32_0 = arith.constant 0 : i32
    %c0_i32_1 = arith.constant 0 : i32
    return %c0_i32, %c0_i32_0 : i32, i32
  }
  func.func @transform_4(%arg0: i32, %arg1: i32) -> (i32, i32) {
    %c0_i32 = arith.constant 0 : i32
    %c0_i32_0 = arith.constant 0 : i32
    %c0_i32_1 = arith.constant 0 : i32
    return %c0_i32, %c0_i32_0 : i32, i32
  }
  func.func @transform_5(%arg0: i32, %arg1: i32) -> (i32, i32) {
    %c0_i32 = arith.constant 0 : i32
    %c0_i32_0 = arith.constant 0 : i32
    %c0_i32_1 = arith.constant 0 : i32
    return %c0_i32, %c0_i32_0 : i32, i32
  }
  func.func @transform_6(%arg0: i32, %arg1: i32) -> (i32, i32) {
    %c0_i32 = arith.constant 0 : i32
    %c0_i32_0 = arith.constant 0 : i32
    %c0_i32_1 = arith.constant 0 : i32
    return %c0_i32, %c0_i32_0 : i32, i32
  }
  func.func @transform_7(%arg0: i32, %arg1: i32) -> (i32, i32) {
    %c0_i32 = arith.constant 0 : i32
    %c0_i32_0 = arith.constant 0 : i32
    %c0_i32_1 = arith.constant 0 : i32
    return %c0_i32, %c0_i32_0 : i32, i32
  }
  func.func @transform_8(%arg0: i32, %arg1: i32) -> (i32, i32, i32) {
    %c0_i32 = arith.constant 0 : i32
    %c0_i32_0 = arith.constant 0 : i32
    %c0_i32_1 = arith.constant 0 : i32
    return %arg0, %c0_i32, %c0_i32_0 : i32, i32, i32
  }
  func.func @transform_9(%arg0: i32, %arg1: i32) -> (i32, i32) {
    %c0_i32 = arith.constant 0 : i32
    %c0_i32_0 = arith.constant 0 : i32
    %c0_i32_1 = arith.constant 0 : i32
    return %c0_i32, %c0_i32_0 : i32, i32
  }
  func.func @transform_10(%arg0: i32, %arg1: i32) -> (i32, i32) {
    %c0_i32 = arith.constant 0 : i32
    %c0_i32_0 = arith.constant 0 : i32
    %c0_i32_1 = arith.constant 0 : i32
    return %c0_i32, %c0_i32_0 : i32, i32
  }
  func.func @transform_11(%arg0: i32, %arg1: i32) -> (i32, i32) {
    %c0_i32 = arith.constant 0 : i32
    %c0_i32_0 = arith.constant 0 : i32
    %c0_i32_1 = arith.constant 0 : i32
    return %c0_i32, %c0_i32_0 : i32, i32
  }
  func.func @transform_12(%arg0: i32, %arg1: i32) -> (i32, i32) {
    %c0_i32 = arith.constant 0 : i32
    %c0_i32_0 = arith.constant 0 : i32
    %c0_i32_1 = arith.constant 0 : i32
    return %c0_i32, %c0_i32_0 : i32, i32
  }
}

</mosaic_0001>

<bundles_post_ra>
// kernel: tpu_custom_call.1
= control target key start
LH: loop header
LB: loop body
LE: loop exit
PB: predicated region body
PF: predicated region fallthrough
CT: control target
= control target key end

     0   :  { %s3319_s0 = inlined_call_operand.vmem [shape: bf16[256,256], index: 0, kind: input, shape index: {}]   ;;  %s3320_s1 = inlined_call_operand.vmem [shape: f32[256,16], index: 1, kind: input, shape index: {}]   ;;  %s3321_s2 = inlined_call_operand.vmem [shape: f32[256,8], index: 2, kind: input, shape index: {}]   ;;  %s3322_s3 = inlined_call_operand.vmem [shape: f32[16,32], index: 3, kind: input, shape index: {}]   ;;  %s3323_s4 = inlined_call_operand.vmem [shape: f32[1,32], index: 4, kind: input, shape index: {}]   ;;  %s3324_s5 = inlined_call_operand.vmem [shape: f32[32,32], index: 5, kind: input, shape index: {}]   ;;  %s3325_s6 = inlined_call_operand.vmem [shape: f32[32,32], index: 6, kind: input, shape index: {}]   ;;  %s3326_s7 = inlined_call_operand.vmem [shape: f32[32,4], index: 7, kind: input, shape index: {}]   ;;  %s3327_s8 = inlined_call_operand.vmem [shape: f32[3,4,16], index: 8, kind: input, shape index: {}]   ;;  %s3328_s9 = inlined_call_operand.vmem [shape: f32[1,16], index: 9, kind: input, shape index: {}]   ;;  %s3329_s10 = inlined_call_operand.vmem [shape: f32[16,5], index: 10, kind: input, shape index: {}]   ;;  %s3330_s11 = inlined_call_operand.vmem [shape: f32[1,5], index: 11, kind: input, shape index: {}]   ;;  %s3331_s12 = inlined_call_operand.hbm [shape: f32[8,5], index: 12, kind: output, shape index: {}]  }
   0x1   :  { %3336 = sst [smem:[#allocation15_spill]] %s3331_s12 }
   0x2   :  { %17 = vsyncpa [#allocation8], 0  ;;  %s2795_s21 = smov 0   ;;  %s2797_s22 = smov 0  }
   0x3   :  { %s2799_s23 = smov 0   ;;  %s2801_s24 = smov 0  }
   0x4   :  { %s2803_s25 = smov 0  }
   0x5 LB: > { %3337 = sst [smem:[#allocation10_spill]] %s2708_s23  ;;  %s32_s27 = sadd.s32 1, %s2708_s23  ;;  %s2716_s25 = sphi %s2803_s25, %s23_s25   ;;  %s2712_s24 = sphi %s2801_s24, %s3350_s24   ;;  %s2708_s23 = sphi %s2799_s23, %s3349_s23   ;;  %s2704_s22 = sphi %s2797_s22, %s3348_s22   ;;  %s2700_s21 = sphi %s2795_s21, %s3347_s21  }
   0x6   : > { %3338 = sst [smem:[#allocation11_spill]] %s2712_s24  ;;  %p33_p0 = scmp.ge.s32.totalorder %s32_s27, 2 }
   0x7   : > { %3339 = sst [smem:[#allocation12_spill]] %s2716_s25  ;;  %s35_s28 = sadd.s32 1, %s2712_s24 }
   0x8   : > { %p2048_p1 = scmp.ge.s32.totalorder %s2716_s25, 1  ;;  %p419_p2 = scmp.lt.s32.totalorder %s2716_s25, 7 }
   0x9   : > { %s3352_s27 = smov (%p33_p0, %s32_s27), 0  ;;  %s3354_s28 = smov (!%p33_p0, %s35_s28), %s2712_s24 }
   0xa   : > { %3340 = sst [smem:[#allocation13_spill]] %s3352_s27  ;;  %p420_p3 = pnand %p2048_p1, %p419_p2 }
   0xb   : > { %p37_p4 = scmp.ge.s32.totalorder %s3354_s28, 3  ;;  %p475_p5 = scmp.gt.s32.totalorder (!%p420_p3), %s2704_s22, 0 }
   0xc   : > { %423 = sbr.rel (%p420_p3) target bundleno = 2455 (0x997), region = 68  ;;  %p486_p6 = scmp.eq.s32.totalorder (!%p420_p3), %s2704_s22, 0 }
   0xd   : > { %s3356_s28 = smov (%p37_p4, %s3354_s28), 0  ;;  %s2054_s29 = sshll.u32 (!%p420_p3), %s2700_s21, 4 }
   0xe   : > { %3341 = sst [smem:[#allocation14_spill]] %s3356_s28  ;;  %p502_p7 = scmp.lt.s32.totalorder (!%p420_p3), %s2704_s22, 2 }
   0xf   : > { %p497_p8 = scmp.lt.s32.totalorder (!%p420_p3), %s2054_s29, 31  ;;  %p507_p11 = scmp.lt.s32.totalorder (!%p420_p3), %s2704_s22, 0 }
  0x10   : > { %s508_s17 = ssub.s32 (!%p420_p3), 0, %s2704_s22  ;;  %p519_p12 = scmp.eq.s32.totalorder (!%p420_p3), %s2700_s21, 0 }
  0x12   : > { %p520_p13 = pnand (!%p420_p3), %p519_p12, %p486_p6 }
  0x13   : > { %s476_s30 = scalar_select %p475_p5, %s2700_s21, 0 }
  0x14   : > { %s487_s13 = scalar_select %p486_p6, %s2700_s21, 0 }
  0x15   : > { %s2049_s14 = sshll.u32 %s476_s30, 4  ;;  %s3362_s29 = smov (!%p497_p8, %s2054_s29), 31  ;;  %v524_v0 = vld [vmem:[%s3325_s6] sm:$0xff] (!%p520_p13)  ;;  %vm528_vm0 = vcmask (!%p520_p13), 261120   ;;  %v525_v1 = vld [vmem:[%s3325_s6 + $0x8] sm:$0xff] (!%p520_p13)  ;;  %v526_v2 = vld [vmem:[%s3325_s6 + $0x10] sm:$0xff] (!%p520_p13) }
  0x16   : > { %p478_p9 = scmp.lt.s32.totalorder %s2049_s14, 31  ;;  %s2052_s15 = sshll.u32 %s487_s13, 4  ;;  %vm533_vm1 = vcmask (!%p520_p13), 130048   ;;  %529 = vst.msk [vmem:[#allocation3] sm:$0xff] (!%p520_p13), %vm528_vm0, %v524_v0  ;;  %530 = vst.msk [vmem:[#allocation3 + $0x8] sm:$0xff] (!%p520_p13), %vm528_vm0, %v525_v1  ;;  %v527_v3 = vld [vmem:[%s3325_s6 + $0x18] sm:$0xff] (!%p520_p13) }
  0x17   : > { %p489_p10 = scmp.lt.s32.totalorder %s2052_s15, 31  ;;  %s2057_s13 = smin.u32 %s2704_s22, %s508_s17  ;;  %531 = vst.msk [vmem:[#allocation3 + $0x10] sm:$0xff] (!%p520_p13), %vm528_vm0, %v526_v2  ;;  %v2718_v4 = vmov (!%p520_p13), 0.0   ;;  %532 = vst.msk [vmem:[#allocation3 + $0x18] sm:$0xff] (!%p520_p13), %vm528_vm0, %v527_v3 }
  0x18   : > { %s3358_s14 = smov (!%p478_p9, %s2049_s14), 31  ;;  %s510_s23 = sand.u32 1, %s2057_s13   ;;  %534 = vst.msk [vmem:[#allocation6] sm:$0xff] (!%p520_p13), %vm533_vm1, %v2718_v4 }
  0x19   : > { %s3360_s15 = smov (!%p489_p10, %s2052_s15), 31  ;;  %s2149_s16 = sshll.u32 %s3358_s14, 3 }
  0x1a   : > { %s2845_s20 = scalar_lea.vmem %s3319_s0, %s2149_s16  ;;  %s2053_s26 = sshll.u32 %s3360_s15, 3 }
  0x1b   : > { %s2850_s27 = scalar_lea.vmem %s3320_s1, %s2053_s26  ;;  %s2055_s14 = sshll.u32 %s3362_s29, 3 }
  0x1c   : > { %s503_s24 = scalar_select %p502_p7, %s2704_s22, 2 }
  0x1d   : > { %s2859_s18 = scalar_lea.vmem %s3321_s2, %s2055_s14  ;;  %s511_s26 = ssub.s32 0, %s510_s23 }
  0x1e   : > { %s2056_s16 = sshll.u32 %s503_s24, 2  ;;  %s3364_s26 = smov (!%p507_p11, %s511_s26), %s510_s23 }
  0x1f   : > { %s2864_s28 = scalar_lea.vmem %s3327_s8, %s2056_s16  ;;  %s2869_s17 = sshll.u32 %s2700_s21, 7 }
  0x20   : > { %s513_s29 = ssub.s32 1, %s3364_s26  ;;  %s2059_s30 = sshll.u32 %s3364_s26, 8 }
  0x21   : > { %s2873_s13 = sadd.s32 %s2059_s30, %s2869_s17  ;;  %s2875_s12 = sshll.u32 %s513_s29, 8 }
  0x22   : > { %523 = sbr.rel (%p520_p13) target bundleno = 41 (0x29), region = 72 }
  0x29 PF: > { %p536_p0 = pnand %p519_p12, %p475_p5 }
  0x2a   : > { %v544_v5 = vld [vmem:[#allocation3] sm:$0xff] (!%p536_p0)  ;;  %v545_v6 = vld [vmem:[#allocation3 + $0x8] sm:$0xff] (!%p536_p0)  ;;  %v546_v7 = vld [vmem:[#allocation3 + $0x10] sm:$0xff] (!%p536_p0)  ;;  %vm548_vm2 = vcmask (!%p536_p0), 261120  }
  0x2b   : > { %539 = sbr.rel (%p536_p0) target bundleno = 267 (0x10b), region = 76  ;;  %v2419_v8 = vpack.c.bf16 (!%p536_p0), %v545_v6, %v544_v5  ;;  %v547_v9 = vld [vmem:[#allocation3 + $0x18] sm:$0xff] (!%p536_p0)  ;;  %v540_v10 = vld [vmem:[%s3324_s5] sm:$0xff] (!%p536_p0)  ;;  %v542_v11 = vld [vmem:[%s3324_s5 + $0x10] sm:$0xff] (!%p536_p0) }
  0x2c   : > { %v2423_v12 = vpack.c.bf16 (!%p536_p0), %v547_v9, %v546_v7  ;;  %2295 = vmatprep.mubr.msk.f32.mxu0 (!%p536_p0), %vm548_vm2, %v540_v10  ;;  %2298 = vmatprep.mubr.msk.f32.mxu1 (!%p536_p0), %vm548_vm2, %v542_v11  ;;  %v541_v13 = vld [vmem:[%s3324_s5 + $0x8] sm:$0xff] (!%p536_p0)  ;;  %v543_v14 = vld [vmem:[%s3324_s5 + $0x18] sm:$0xff] (!%p536_p0) }
  0x2d   : > { %2420 = vmatprep.subr.bf16.mxu0 (!%p536_p0), %v2419_v8  ;;  %2476 = vmatprep.subr.bf16.mxu1 (!%p536_p0), %v2419_v8 }
  0x2e   : > { %2422 = vmatpush3.bf16.msra.mxu0 (!%p536_p0), %v2419_v8  ;;  %2478 = vmatpush3.bf16.msra.mxu1 (!%p536_p0), %v2419_v8 }
  0x2f   : > { %2424 = vmatprep.subr.bf16.mxu0 (!%p536_p0), %v2423_v12  ;;  %2477 = vmatprep.subr.bf16.mxu1 (!%p536_p0), %v2423_v12 }
  0x32   : > { %2426 = vmatpush3.bf16.msra.mxu0 %v2423_v12  ;;  %2479 = vmatpush3.bf16.msra.mxu1 %v2423_v12 }
  0x35   : > { %2296 = vmatmul.mubr.msk.f32.vlgmr.msra.gmra.mrb[0].mxu0 %vm548_vm2, %v541_v13  ;;  %2299 = vmatmul.mubr.msk.f32.vlgmr.msra.gmra.mrb[0].mxu1 %vm548_vm2, %v543_v14 }
 0x108   : > { %v2297_v15 = vpop.f32.mrb[0].mxu0  ;;  %v2300_v16 = vpop.f32.mrb[0].mxu1 }
 0x109   : > { %647 = vst.msk [vmem:[#allocation3 + $0x8] sm:$0xff] %vm548_vm2, %v2297_v15  ;;  %649 = vst.msk [vmem:[#allocation3 + $0x18] sm:$0xff] %vm548_vm2, %v2300_v16  ;;  %v627_v17 = vpop.f32.mrb[1].mxu0  ;;  %v637_v18 = vpop.f32.mrb[1].mxu1 }
 0x10a   : > { %646 = vst.msk [vmem:[#allocation3] sm:$0xff] %vm548_vm2, %v627_v17  ;;  %648 = vst.msk [vmem:[#allocation3 + $0x10] sm:$0xff] %vm548_vm2, %v637_v18 }
 0x10b PF: > { %p2065_p1 = scmp.ne.s32.totalorder %s2700_s21, 0 }
 0x10c   : > { %vm653_vm3 = vcmask (!%p2065_p1), 261120   ;;  %v2719_v19 = vmov (!%p2065_p1), 0.0  }
 0x10d   : > { %652 = sbr.rel (%p2065_p1) target bundleno = 276 (0x114), region = 80  ;;  %654 = vst.msk [vmem:[#allocation5] sm:$0xff] (!%p2065_p1), %vm653_vm3, %v2719_v19 }
 0x114 PF: > { %p2066_p2 = scmp.ne.s32.totalorder %s2704_s22, 0 }
 0x115   : > { %v674_v20 = vld [vmem:[%s3322_s3] sm:$0xff] (!%p2066_p2)  ;;  %v675_v21 = vld [vmem:[%s3322_s3 + $0x8] sm:$0xff] (!%p2066_p2)  ;;  %vm683_vm4 = vcmask (!%p2066_p2), 130048   ;;  %v660_v27 = vld [vmem:[%s2850_s27 + $0x10] sm:$0xff] (!%p2066_p2)  ;;  %vm974_vm5 = vcmask (!%p2066_p2), 261120  }
 0x116   : > { %657 = sbr.rel (%p2066_p2) target bundleno = 553 (0x229), region = 84  ;;  %v658_v22 = vld [vmem:[%s2850_s27] sm:$0xff] (!%p2066_p2)  ;;  %v2427_v23 = vpack.c.bf16 (!%p2066_p2), %v675_v21, %v674_v20  ;;  %v659_v25 = vld [vmem:[%s2850_s27 + $0x8] sm:$0xff] (!%p2066_p2)  ;;  %v668_v28 = vld [vmem:[%s2850_s27 + $0x50] sm:$0xff] (!%p2066_p2) }
 0x117   : > { %2305 = vmatprep.mubr.msk.f32.mxu0 (!%p2066_p2), %vm683_vm4, %v658_v22  ;;  %v666_v24 = vld [vmem:[%s2850_s27 + $0x40] sm:$0xff] (!%p2066_p2)  ;;  %v667_v26 = vld [vmem:[%s2850_s27 + $0x48] sm:$0xff] (!%p2066_p2)  ;;  %v661_v29 = vld [vmem:[%s2850_s27 + $0x18] sm:$0xff] (!%p2066_p2) }
 0x118   : > { %2317 = vmatprep.mubr.msk.f32.mxu1 (!%p2066_p2), %vm683_vm4, %v666_v24  ;;  %2428 = vmatprep.subr.bf16.mxu0 (!%p2066_p2), %v2427_v23  ;;  %v669_v30 = vld [vmem:[%s2850_s27 + $0x58] sm:$0xff] (!%p2066_p2)  ;;  %v662_v31 = vld [vmem:[%s2850_s27 + $0x20] sm:$0xff] (!%p2066_p2)  ;;  %v663_v33 = vld [vmem:[%s2850_s27 + $0x28] sm:$0xff] (!%p2066_p2) }
 0x119   : > { %2480 = vmatprep.subr.bf16.mxu1 (!%p2066_p2), %v2427_v23  ;;  %2430 = vmatpush3.bf16.msra.mxu0 (!%p2066_p2), %v2427_v23  ;;  %v670_v32 = vld [vmem:[%s2850_s27 + $0x60] sm:$0xff] (!%p2066_p2)  ;;  %v671_v34 = vld [vmem:[%s2850_s27 + $0x68] sm:$0xff] (!%p2066_p2)  ;;  %v664_v35 = vld [vmem:[%s2850_s27 + $0x30] sm:$0xff] (!%p2066_p2) }
 0x11a   : > { %2481 = vmatpush3.bf16.msra.mxu1 (!%p2066_p2), %v2427_v23  ;;  %v672_v36 = vld [vmem:[%s2850_s27 + $0x70] sm:$0xff] (!%p2066_p2)  ;;  %v665_v37 = vld [vmem:[%s2850_s27 + $0x38] sm:$0xff] (!%p2066_p2)  ;;  %v2962_v39 = vld [vmem:[%s3323_s4] ss:$0 sm:$0xff] (!%p2066_p2) }
 0x11b   : > { %v673_v38 = vld [vmem:[%s2850_s27 + $0x78] sm:$0xff] (!%p2066_p2)  ;;  %s2981_s27 = scalar_lea.vmem (!%p2066_p2), [#allocation2], %s2873_s13 }
 0x11c   : > { %2306 = vmatmul.mubr.msk.f32.vlgmr.msra.gmra.mrb[0].mxu0 (!%p2066_p2), %vm683_vm4, %v659_v25 }
 0x11d   : > { %2318 = vmatmul.mubr.msk.f32.vlgmr.msra.gmra.mrb[0].mxu1 %vm683_vm4, %v667_v26  ;;  %2308 = vmatprep.mubr.msk.f32.mxu0 %vm683_vm4, %v660_v27 }
 0x11e   : > { %2320 = vmatprep.mubr.msk.f32.mxu1 %vm683_vm4, %v668_v28 }
 0x120   : > { %2309 = vmatmul.mubr.msk.f32.gmra.mrb[2].mxu0 %vm683_vm4, %v661_v29 }
 0x121   : > { %2321 = vmatmul.mubr.msk.f32.gmra.mrb[2].mxu1 %vm683_vm4, %v669_v30  ;;  %2311 = vmatprep.mubr.msk.f32.mxu0 %vm683_vm4, %v662_v31 }
 0x122   : > { %2323 = vmatprep.mubr.msk.f32.mxu1 %vm683_vm4, %v670_v32 }
 0x124   : > { %2312 = vmatmul.mubr.msk.f32.gmra.mrb[4].mxu0 %vm683_vm4, %v663_v33 }
 0x125   : > { %2324 = vmatmul.mubr.msk.f32.gmra.mrb[4].mxu1 %vm683_vm4, %v671_v34  ;;  %2314 = vmatprep.mubr.msk.f32.mxu0 %vm683_vm4, %v664_v35 }
 0x126   : > { %2326 = vmatprep.mubr.msk.f32.mxu1 %vm683_vm4, %v672_v36 }
 0x128   : > { %2315 = vmatmul.mubr.msk.f32.gmra.mrb[6].mxu0 %vm683_vm4, %v665_v37 }
 0x129   : > { %2327 = vmatmul.mubr.msk.f32.gmra.mrb[6].mxu1 %vm683_vm4, %v673_v38 }
 0x1ef   : > { %v2307_v40 = vpop.f32.mrb[0].mxu0 }
 0x1f0   : > { %v2319_v41 = vpop.f32.mrb[0].mxu1  ;;  %v804_v42 = vadd.f32 %v2307_v40, %v2962_v39  ;;  %v798_v44 = vpop.f32.mrb[1].mxu0 }
 0x1f1   : > { %v844_v43 = vadd.f32 %v2319_v41, %v2962_v39  ;;  %v838_v45 = vpop.f32.mrb[1].mxu1  ;;  %v799_v46 = vadd.f32 %v2962_v39, %v798_v44 }
 0x1f2   : > { %v839_v47 = vadd.f32 %v2962_v39, %v838_v45  ;;  %v2085_v48 = vmul.f32 -1.442695, %v804_v42 }
 0x1f3   : > { %v2093_v49 = vmul.f32 -1.442695, %v844_v43  ;;  %v2084_v50 = vmul.f32 -1.442695, %v799_v46  ;;  %v2310_v52 = vpop.f32.mrb[2].mxu0 }
 0x1f4   : > { %v2092_v51 = vmul.f32 -1.442695, %v839_v47  ;;  %v2322_v53 = vpop.f32.mrb[2].mxu1  ;;  %2556 = vpow2.f32 %v2085_v48  ;;  %v814_v54 = vadd.f32 %v2310_v52, %v2962_v39  ;;  %v808_v56 = vpop.f32.mrb[3].mxu0 }
 0x1f5   : > { %v854_v55 = vadd.f32 %v2322_v53, %v2962_v39  ;;  %v848_v57 = vpop.f32.mrb[3].mxu1  ;;  %2558 = vpow2.f32 %v2093_v49  ;;  %v809_v58 = vadd.f32 %v2962_v39, %v808_v56 }
 0x1f6   : > { %v849_v59 = vadd.f32 %v2962_v39, %v848_v57  ;;  %2560 = vpow2.f32 %v2084_v50  ;;  %v2087_v60 = vmul.f32 -1.442695, %v814_v54 }
 0x1f7   : > { %v2095_v61 = vmul.f32 -1.442695, %v854_v55  ;;  %2562 = vpow2.f32 %v2092_v51  ;;  %v2086_v62 = vmul.f32 -1.442695, %v809_v58  ;;  %v2313_v0 = vpop.f32.mrb[4].mxu0 }
 0x1f8   : > { %v2094_v63 = vmul.f32 -1.442695, %v849_v59  ;;  %v2325_v1 = vpop.f32.mrb[4].mxu1  ;;  %2564 = vpow2.f32 %v2087_v60  ;;  %v824_v2 = vadd.f32 %v2313_v0, %v2962_v39  ;;  %v818_v4 = vpop.f32.mrb[5].mxu0 }
 0x1f9   : > { %v864_v3 = vadd.f32 %v2325_v1, %v2962_v39  ;;  %v858_v5 = vpop.f32.mrb[5].mxu1  ;;  %2566 = vpow2.f32 %v2095_v61  ;;  %v819_v6 = vadd.f32 %v2962_v39, %v818_v4 }
 0x1fa   : > { %v859_v7 = vadd.f32 %v2962_v39, %v858_v5  ;;  %2568 = vpow2.f32 %v2086_v62  ;;  %v2089_v8 = vmul.f32 -1.442695, %v824_v2 }
 0x1fb   : > { %v2097_v9 = vmul.f32 -1.442695, %v864_v3  ;;  %2570 = vpow2.f32 %v2094_v63  ;;  %v2088_v10 = vmul.f32 -1.442695, %v819_v6  ;;  %v2316_v12 = vpop.f32.mrb[6].mxu0 }
 0x1fc   : > { %v2096_v11 = vmul.f32 -1.442695, %v859_v7  ;;  %v2328_v13 = vpop.f32.mrb[6].mxu1  ;;  %2572 = vpow2.f32 %v2089_v8  ;;  %v834_v14 = vadd.f32 %v2316_v12, %v2962_v39  ;;  %v828_v15 = vpop.f32.mrb[7].mxu0 }
 0x1fd   : > { %v868_v16 = vpop.f32.mrb[7].mxu1  ;;  %2574 = vpow2.f32 %v2097_v9  ;;  %v874_v35 = vadd.f32 %v2328_v13, %v2962_v39  ;;  %v829_v38 = vadd.f32 %v2962_v39, %v828_v15 }
 0x1fe   : > { %v2557_v17 = vpop.eup %2556  ;;  %2576 = vpow2.f32 %v2088_v10  ;;  %v2091_v18 = vmul.f32 -1.442695, %v834_v14  ;;  %v869_v42 = vadd.f32 %v2962_v39, %v868_v16 }
 0x1ff   : > { %v2559_v19 = vpop.eup %2558  ;;  %v926_v20 = vadd.f32 1.0, %v2557_v17  ;;  %2578 = vpow2.f32 %v2096_v11  ;;  %v2099_v47 = vmul.f32 -1.442695, %v874_v35  ;;  %v2090_v50 = vmul.f32 -1.442695, %v829_v38 }
 0x200   : > { %v2561_v21 = vpop.eup %2560  ;;  %v934_v22 = vadd.f32 1.0, %v2559_v19  ;;  %2580 = vpow2.f32 %v2091_v18  ;;  %v2098_v39 = vmul.f32 -1.442695, %v869_v42 }
 0x201   : > { %v2563_v23 = vpop.eup %2562  ;;  %2582 = vrcp.f32 %v926_v20  ;;  %v925_v24 = vadd.f32 1.0, %v2561_v21 }
 0x202   : > { %v2565_v25 = vpop.eup %2564  ;;  %2584 = vrcp.f32 %v934_v22  ;;  %v933_v26 = vadd.f32 1.0, %v2563_v23 }
 0x203   : > { %v2567_v27 = vpop.eup %2566  ;;  %2586 = vrcp.f32 %v925_v24  ;;  %v928_v28 = vadd.f32 1.0, %v2565_v25 }
 0x204   : > { %v2569_v29 = vpop.eup %2568  ;;  %2588 = vrcp.f32 %v933_v26  ;;  %v936_v30 = vadd.f32 1.0, %v2567_v27 }
 0x205   : > { %v2571_v31 = vpop.eup %2570  ;;  %2590 = vrcp.f32 %v928_v28  ;;  %v927_v32 = vadd.f32 1.0, %v2569_v29 }
 0x206   : > { %v2573_v33 = vpop.eup %2572  ;;  %2592 = vrcp.f32 %v936_v30  ;;  %v935_v34 = vadd.f32 1.0, %v2571_v31 }
 0x207   : > { %v2575_v36 = vpop.eup %2574  ;;  %2594 = vrcp.f32 %v927_v32  ;;  %v930_v37 = vadd.f32 1.0, %v2573_v33 }
 0x208   : > { %v2577_v40 = vpop.eup %2576  ;;  %2596 = vrcp.f32 %v935_v34  ;;  %v938_v41 = vadd.f32 1.0, %v2575_v36 }
 0x209   : > { %v2579_v43 = vpop.eup %2578  ;;  %2598 = vrcp.f32 %v930_v37  ;;  %v929_v44 = vadd.f32 1.0, %v2577_v40 }
 0x20a   : > { %v2581_v45 = vpop.eup %2580  ;;  %2600 = vrcp.f32 %v938_v41  ;;  %v937_v46 = vadd.f32 1.0, %v2579_v43 }
 0x20b   : > { %v2583_v48 = vpop.eup %2582  ;;  %2602 = vrcp.f32 %v929_v44  ;;  %v932_v49 = vadd.f32 1.0, %v2581_v45 }
 0x20c   : > { %v2585_v51 = vpop.eup %2584  ;;  %976 = vst.msk [vmem:[%s2981_s27 + $0x8] sm:$0xff] %vm974_vm5, %v2583_v48  ;;  %2604 = vrcp.f32 %v937_v46 }
 0x20d   : > { %v2587_v52 = vpop.eup %2586  ;;  %984 = vst.msk [vmem:[%s2981_s27 + $0x48] sm:$0xff] %vm974_vm5, %v2585_v51  ;;  %2606 = vrcp.f32 %v932_v49 }
 0x20e   : > { %v2589_v53 = vpop.eup %2588  ;;  %975 = vst.msk [vmem:[%s2981_s27] sm:$0xff] %vm974_vm5, %v2587_v52  ;;  %2608 = vpow2.f32 %v2099_v47 }
 0x20f   : > { %v2591_v54 = vpop.eup %2590  ;;  %983 = vst.msk [vmem:[%s2981_s27 + $0x40] sm:$0xff] %vm974_vm5, %v2589_v53  ;;  %2610 = vpow2.f32 %v2090_v50 }
 0x210   : > { %v2593_v55 = vpop.eup %2592  ;;  %978 = vst.msk [vmem:[%s2981_s27 + $0x18] sm:$0xff] %vm974_vm5, %v2591_v54  ;;  %2612 = vpow2.f32 %v2098_v39 }
 0x211   : > { %v2595_v56 = vpop.eup %2594  ;;  %986 = vst.msk [vmem:[%s2981_s27 + $0x58] sm:$0xff] %vm974_vm5, %v2593_v55 }
 0x212   : > { %v2597_v57 = vpop.eup %2596  ;;  %977 = vst.msk [vmem:[%s2981_s27 + $0x10] sm:$0xff] %vm974_vm5, %v2595_v56 }
 0x213   : > { %v2599_v58 = vpop.eup %2598  ;;  %985 = vst.msk [vmem:[%s2981_s27 + $0x50] sm:$0xff] %vm974_vm5, %v2597_v57 }
 0x214   : > { %v2601_v59 = vpop.eup %2600  ;;  %980 = vst.msk [vmem:[%s2981_s27 + $0x28] sm:$0xff] %vm974_vm5, %v2599_v58 }
 0x215   : > { %v2603_v60 = vpop.eup %2602  ;;  %988 = vst.msk [vmem:[%s2981_s27 + $0x68] sm:$0xff] %vm974_vm5, %v2601_v59 }
 0x216   : > { %v2605_v61 = vpop.eup %2604  ;;  %979 = vst.msk [vmem:[%s2981_s27 + $0x20] sm:$0xff] %vm974_vm5, %v2603_v60 }
 0x217   : > { %v2607_v62 = vpop.eup %2606  ;;  %987 = vst.msk [vmem:[%s2981_s27 + $0x60] sm:$0xff] %vm974_vm5, %v2605_v61 }
 0x218   : > { %v2609_v63 = vpop.eup %2608  ;;  %982 = vst.msk [vmem:[%s2981_s27 + $0x38] sm:$0xff] %vm974_vm5, %v2607_v62 }
 0x219   : > { %v2611_v0 = vpop.eup %2610  ;;  %v940_v1 = vadd.f32 1.0, %v2609_v63 }
 0x21a   : > { %v2613_v2 = vpop.eup %2612  ;;  %v931_v3 = vadd.f32 1.0, %v2611_v0 }
 0x21b   : > { %2614 = vrcp.f32 %v940_v1  ;;  %v939_v4 = vadd.f32 1.0, %v2613_v2 }
 0x21c   : > { %2616 = vrcp.f32 %v931_v3 }
 0x21d   : > { %2618 = vrcp.f32 %v939_v4 }
 0x225   : > { %v2615_v5 = vpop.eup %2614 }
 0x226   : > { %v2617_v6 = vpop.eup %2616  ;;  %990 = vst.msk [vmem:[%s2981_s27 + $0x78] sm:$0xff] %vm974_vm5, %v2615_v5 }
 0x227   : > { %v2619_v7 = vpop.eup %2618  ;;  %981 = vst.msk [vmem:[%s2981_s27 + $0x30] sm:$0xff] %vm974_vm5, %v2617_v6 }
 0x228   : > { %989 = vst.msk [vmem:[%s2981_s27 + $0x70] sm:$0xff] %vm974_vm5, %v2619_v7 }
 0x229 PF: > { %p2100_p3 = scmp.le.s32.totalorder %s2704_s22, 0 }
 0x22a   : > { %s3017_s23 = scalar_lea.vmem (!%p2100_p3), [#allocation2], %s2875_s12  ;;  %v2622_v33 = vld [vmem:[%s2845_s20 + $0x4] ss:$8 sps:$4 sm:$0xff] (!%p2100_p3)   ;;  %v2620_v58 = vld [vmem:[%s2845_s20] ss:$8 sps:$4 sm:$0xff] (!%p2100_p3)   ;;  %vm1237_vm6 = vcmask (!%p2100_p3), 261120  }
 0x22b   : > { %993 = sbr.rel (%p2100_p3) target bundleno = 836 (0x344), region = 88  ;;  %v2625_v36 = vld [vmem:[%s2845_s20 + $0x44] ss:$8 sps:$4 sm:$0xff] (!%p2100_p3)   ;;  %1171 = vmatprep.mubr.bf16.mxu0 (!%p2100_p3), %v2622_v33  ;;  %v2623_v59 = vld [vmem:[%s2845_s20 + $0x40] ss:$8 sps:$4 sm:$0xff] (!%p2100_p3)   ;;  %s3068_s12 = scalar_lea.vmem (!%p2100_p3), [#allocation2], %s2873_s13 }
 0x22c   : > { %1203 = vmatprep.mubr.bf16.mxu1 (!%p2100_p3), %v2625_v36  ;;  %v2626_v60 = vld [vmem:[%s2845_s20 + $0x14] ss:$8 sps:$4 sm:$0xff] (!%p2100_p3)   ;;  %v2630_v62 = vld [vmem:[%s2845_s20 + $0x10] ss:$8 sps:$4 sm:$0xff] (!%p2100_p3)   ;;  %v2632_v0 = vld [vmem:[%s2845_s20 + $0x24] ss:$8 sps:$4 sm:$0xff] (!%p2100_p3)  }
 0x22d   : > { %v2628_v61 = vld [vmem:[%s2845_s20 + $0x54] ss:$8 sps:$4 sm:$0xff] (!%p2100_p3)   ;;  %v2631_v63 = vld [vmem:[%s2845_s20 + $0x50] ss:$8 sps:$4 sm:$0xff] (!%p2100_p3)   ;;  %v2634_v1 = vld [vmem:[%s2845_s20 + $0x64] ss:$8 sps:$4 sm:$0xff] (!%p2100_p3)  }
 0x22e   : > { %v2636_v2 = vld [vmem:[%s2845_s20 + $0x20] ss:$8 sps:$4 sm:$0xff] (!%p2100_p3)   ;;  %v2638_v4 = vld [vmem:[%s2845_s20 + $0x34] ss:$8 sps:$4 sm:$0xff] (!%p2100_p3)   ;;  %v2642_v6 = vld [vmem:[%s2845_s20 + $0x30] ss:$8 sps:$4 sm:$0xff] (!%p2100_p3)  }
 0x22f   : > { %v1011_v8 = vld [vmem:[%s3017_s23 + $0x80] sm:$0xff] (!%p2100_p3)  ;;  %v1012_v9 = vld [vmem:[%s3017_s23 + $0x88] sm:$0xff] (!%p2100_p3)  ;;  %v1013_v13 = vld [vmem:[%s3017_s23 + $0x90] sm:$0xff] (!%p2100_p3) }
 0x230   : > { %v995_v10 = vld [vmem:[%s3017_s23] sm:$0xff] (!%p2100_p3)  ;;  %v1035_v11 = vpack.c.bf16 (!%p2100_p3), %v1012_v9, %v1011_v8  ;;  %v996_v12 = vld [vmem:[%s3017_s23 + $0x8] sm:$0xff] (!%p2100_p3)  ;;  %v1014_v14 = vld [vmem:[%s3017_s23 + $0x98] sm:$0xff] (!%p2100_p3) }
 0x231   : > { %v1027_v15 = vpack.c.bf16 (!%p2100_p3), %v996_v12, %v995_v10  ;;  %v1036_v16 = vpack.c.bf16 (!%p2100_p3), %v1014_v14, %v1013_v13  ;;  %v997_v17 = vld [vmem:[%s3017_s23 + $0x10] sm:$0xff] (!%p2100_p3)  ;;  %v998_v18 = vld [vmem:[%s3017_s23 + $0x18] sm:$0xff] (!%p2100_p3)  ;;  %v1015_v19 = vld [vmem:[%s3017_s23 + $0xa0] sm:$0xff] (!%p2100_p3) }
 0x232   : > { %2176 = vmatprep.subr.bf16.mxu0 %v1035_v11  ;;  %2482 = vmatprep.subr.bf16.mxu1 %v1035_v11  ;;  %v1016_v20 = vld [vmem:[%s3017_s23 + $0xa8] sm:$0xff]  ;;  %v1028_v21 = vpack.c.bf16 %v998_v18, %v997_v17  ;;  %v999_v23 = vld [vmem:[%s3017_s23 + $0x20] sm:$0xff]  ;;  %v1017_v25 = vld [vmem:[%s3017_s23 + $0xb0] sm:$0xff] }
 0x233   : > { %2177 = vmatpush3.bf16.msra.mxu0 %v1027_v15  ;;  %2490 = vmatpush3.bf16.msra.mxu1 %v1027_v15  ;;  %v1037_v22 = vpack.c.bf16 %v1016_v20, %v1015_v19  ;;  %v1000_v24 = vld [vmem:[%s3017_s23 + $0x28] sm:$0xff]  ;;  %v1018_v26 = vld [vmem:[%s3017_s23 + $0xb8] sm:$0xff]  ;;  %v1001_v29 = vld [vmem:[%s3017_s23 + $0x30] sm:$0xff] }
 0x234   : > { %2178 = vmatprep.subr.bf16.mxu0 %v1036_v16  ;;  %2483 = vmatprep.subr.bf16.mxu1 %v1036_v16  ;;  %v1029_v27 = vpack.c.bf16 %v1000_v24, %v999_v23  ;;  %v1038_v28 = vpack.c.bf16 %v1018_v26, %v1017_v25  ;;  %v1002_v30 = vld [vmem:[%s3017_s23 + $0x38] sm:$0xff]  ;;  %v1019_v31 = vld [vmem:[%s3017_s23 + $0xc0] sm:$0xff]  ;;  %v1020_v32 = vld [vmem:[%s3017_s23 + $0xc8] sm:$0xff] }
 0x235   : > { %v1003_v34 = vld [vmem:[%s3017_s23 + $0x40] sm:$0xff]  ;;  %v1030_v35 = vpack.c.bf16 %v1002_v30, %v1001_v29  ;;  %v1039_v37 = vpack.c.bf16 %v1020_v32, %v1019_v31  ;;  %v1004_v38 = vld [vmem:[%s3017_s23 + $0x48] sm:$0xff]  ;;  %v1021_v40 = vld [vmem:[%s3017_s23 + $0xd0] sm:$0xff] }
 0x236   : > { %v1022_v41 = vld [vmem:[%s3017_s23 + $0xd8] sm:$0xff]  ;;  %v1031_v42 = vpack.c.bf16 %v1004_v38, %v1003_v34  ;;  %v1005_v43 = vld [vmem:[%s3017_s23 + $0x50] sm:$0xff]  ;;  %v1023_v46 = vld [vmem:[%s3017_s23 + $0xe0] sm:$0xff] }
 0x237   : > { %2179 = vmatpush3.bf16.msra.mxu0 %v1028_v21  ;;  %2491 = vmatpush3.bf16.msra.mxu1 %v1028_v21  ;;  %v1040_v44 = vpack.c.bf16 %v1022_v41, %v1021_v40  ;;  %v1006_v45 = vld [vmem:[%s3017_s23 + $0x58] sm:$0xff]  ;;  %v1024_v47 = vld [vmem:[%s3017_s23 + $0xe8] sm:$0xff]  ;;  %v1007_v50 = vld [vmem:[%s3017_s23 + $0x60] sm:$0xff] }
 0x238   : > { %2180 = vmatprep.subr.bf16.mxu0 %v1037_v22  ;;  %2484 = vmatprep.subr.bf16.mxu1 %v1037_v22  ;;  %v1032_v48 = vpack.c.bf16 %v1006_v45, %v1005_v43  ;;  %v1041_v49 = vpack.c.bf16 %v1024_v47, %v1023_v46  ;;  %v1008_v51 = vld [vmem:[%s3017_s23 + $0x68] sm:$0xff]  ;;  %v1025_v39 = vld [vmem:[%s3017_s23 + $0xf0] sm:$0xff]  ;;  %v1026_v52 = vld [vmem:[%s3017_s23 + $0xf8] sm:$0xff] }
 0x239   : > { %v1033_v53 = vpack.c.bf16 %v1008_v51, %v1007_v50  ;;  %v1042_v54 = vpack.c.bf16 %v1026_v52, %v1025_v39  ;;  %v1009_v55 = vld [vmem:[%s3017_s23 + $0x70] sm:$0xff]  ;;  %v1010_v56 = vld [vmem:[%s3017_s23 + $0x78] sm:$0xff]  ;;  %v2637_v3 = vld [vmem:[%s2845_s20 + $0x60] ss:$8 sps:$4 sm:$0xff]  }
 0x23a   : > { %v1034_v57 = vpack.c.bf16 %v1010_v56, %v1009_v55  ;;  %v2640_v5 = vld [vmem:[%s2845_s20 + $0x74] ss:$8 sps:$4 sm:$0xff]   ;;  %v2643_v7 = vld [vmem:[%s2845_s20 + $0x70] ss:$8 sps:$4 sm:$0xff]  }
 0x23b   : > { %2181 = vmatpush3.bf16.msra.mxu0 %v1029_v27  ;;  %2492 = vmatpush3.bf16.msra.mxu1 %v1029_v27 }
 0x23c   : > { %2182 = vmatprep.subr.bf16.mxu0 %v1038_v28  ;;  %2485 = vmatprep.subr.bf16.mxu1 %v1038_v28 }
 0x23f   : > { %2183 = vmatpush3.bf16.msra.mxu0 %v1030_v35  ;;  %2493 = vmatpush3.bf16.msra.mxu1 %v1030_v35 }
 0x240   : > { %2184 = vmatprep.subr.bf16.mxu0 %v1039_v37  ;;  %2486 = vmatprep.subr.bf16.mxu1 %v1039_v37 }
 0x243   : > { %2185 = vmatpush3.bf16.msra.mxu0 %v1031_v42  ;;  %2494 = vmatpush3.bf16.msra.mxu1 %v1031_v42 }
 0x244   : > { %2186 = vmatprep.subr.bf16.mxu0 %v1040_v44  ;;  %2487 = vmatprep.subr.bf16.mxu1 %v1040_v44 }
 0x247   : > { %2187 = vmatpush3.bf16.msra.mxu0 %v1032_v48  ;;  %2495 = vmatpush3.bf16.msra.mxu1 %v1032_v48 }
 0x248   : > { %2188 = vmatprep.subr.bf16.mxu0 %v1041_v49  ;;  %2488 = vmatprep.subr.bf16.mxu1 %v1041_v49 }
 0x24b   : > { %2189 = vmatpush3.bf16.msra.mxu0 %v1033_v53  ;;  %2496 = vmatpush3.bf16.msra.mxu1 %v1033_v53 }
 0x24c   : > { %2190 = vmatprep.subr.bf16.mxu0 %v1042_v54  ;;  %2489 = vmatprep.subr.bf16.mxu1 %v1042_v54 }
 0x24f   : > { %2191 = vmatpush3.bf16.msra.mxu0 %v1034_v57  ;;  %2497 = vmatpush3.bf16.msra.mxu1 %v1034_v57 }
 0x252   : > { %1172 = vmatmul.mubr.bf16.vlgmr.msra.gmra.mrb[0].mxu0 %v2620_v58  ;;  %1204 = vmatmul.mubr.bf16.vlgmr.msra.gmra.mrb[0].mxu1 %v2623_v59 }
 0x253   : > { %1179 = vmatprep.mubr.bf16.mxu0 %v2626_v60  ;;  %1211 = vmatprep.mubr.bf16.mxu1 %v2628_v61 }
 0x25a   : > { %1180 = vmatmul.mubr.bf16.gmra.mrb[4].mxu0 %v2630_v62  ;;  %1212 = vmatmul.mubr.bf16.gmra.mrb[4].mxu1 %v2631_v63 }
 0x25b   : > { %1187 = vmatprep.mubr.bf16.mxu0 %v2632_v0  ;;  %1219 = vmatprep.mubr.bf16.mxu1 %v2634_v1 }
 0x262   : > { %1188 = vmatmul.mubr.bf16.gmra.mrb[8].mxu0 %v2636_v2  ;;  %1220 = vmatmul.mubr.bf16.gmra.mrb[8].mxu1 %v2637_v3 }
 0x263   : > { %1195 = vmatprep.mubr.bf16.mxu0 %v2638_v4  ;;  %1227 = vmatprep.mubr.bf16.mxu1 %v2640_v5 }
 0x26a   : > { %1196 = vmatmul.mubr.bf16.gmra.mrb[12].mxu0 %v2642_v6  ;;  %1228 = vmatmul.mubr.bf16.gmra.mrb[12].mxu1 %v2643_v7 }
 0x325   : > { %v2192_v8 = vpop.f32.mrb[0].mxu0  ;;  %v2216_v9 = vpop.f32.mrb[0].mxu1 }
 0x326   : > { %v2193_v10 = vpop.f32.mrb[1].mxu0  ;;  %v2217_v11 = vpop.f32.mrb[1].mxu1 }
 0x327   : > { %v2194_v12 = vadd.f32 %v2193_v10, %v2192_v8  ;;  %v2218_v13 = vadd.f32 %v2217_v11, %v2216_v9  ;;  %v2195_v14 = vpop.f32.mrb[2].mxu0  ;;  %v2219_v15 = vpop.f32.mrb[2].mxu1 }
 0x328   : > { %v2196_v16 = vpop.f32.mrb[3].mxu0  ;;  %v2220_v17 = vpop.f32.mrb[3].mxu1 }
 0x329   : > { %1238 = vst.msk [vmem:[%s3068_s12] sm:$0xff] %vm1237_vm6, %v2194_v12  ;;  %1246 = vst.msk [vmem:[%s3068_s12 + $0x40] sm:$0xff] %vm1237_vm6, %v2218_v13  ;;  %v2197_v18 = vadd.f32 %v2196_v16, %v2195_v14  ;;  %v2221_v19 = vadd.f32 %v2220_v17, %v2219_v15 }
 0x32b   : > { %1239 = vst.msk [vmem:[%s3068_s12 + $0x8] sm:$0xff] %vm1237_vm6, %v2197_v18  ;;  %1247 = vst.msk [vmem:[%s3068_s12 + $0x48] sm:$0xff] %vm1237_vm6, %v2221_v19 }
 0x32d   : > { %v2198_v20 = vpop.f32.mrb[4].mxu0  ;;  %v2222_v21 = vpop.f32.mrb[4].mxu1 }
 0x32e   : > { %v2199_v22 = vpop.f32.mrb[5].mxu0  ;;  %v2223_v23 = vpop.f32.mrb[5].mxu1 }
 0x32f   : > { %v2200_v24 = vadd.f32 %v2199_v22, %v2198_v20  ;;  %v2224_v25 = vadd.f32 %v2223_v23, %v2222_v21  ;;  %v2201_v26 = vpop.f32.mrb[6].mxu0  ;;  %v2225_v27 = vpop.f32.mrb[6].mxu1 }
 0x330   : > { %v2202_v28 = vpop.f32.mrb[7].mxu0  ;;  %v2226_v29 = vpop.f32.mrb[7].mxu1 }
 0x331   : > { %1240 = vst.msk [vmem:[%s3068_s12 + $0x10] sm:$0xff] %vm1237_vm6, %v2200_v24  ;;  %1248 = vst.msk [vmem:[%s3068_s12 + $0x50] sm:$0xff] %vm1237_vm6, %v2224_v25  ;;  %v2203_v30 = vadd.f32 %v2202_v28, %v2201_v26  ;;  %v2227_v31 = vadd.f32 %v2226_v29, %v2225_v27 }
 0x333   : > { %1241 = vst.msk [vmem:[%s3068_s12 + $0x18] sm:$0xff] %vm1237_vm6, %v2203_v30  ;;  %1249 = vst.msk [vmem:[%s3068_s12 + $0x58] sm:$0xff] %vm1237_vm6, %v2227_v31 }
 0x335   : > { %v2204_v32 = vpop.f32.mrb[8].mxu0  ;;  %v2228_v33 = vpop.f32.mrb[8].mxu1 }
 0x336   : > { %v2205_v34 = vpop.f32.mrb[9].mxu0  ;;  %v2229_v35 = vpop.f32.mrb[9].mxu1 }
 0x337   : > { %v2206_v36 = vadd.f32 %v2205_v34, %v2204_v32  ;;  %v2230_v37 = vadd.f32 %v2229_v35, %v2228_v33  ;;  %v2207_v38 = vpop.f32.mrb[10].mxu0  ;;  %v2231_v40 = vpop.f32.mrb[10].mxu1 }
 0x338   : > { %v2208_v41 = vpop.f32.mrb[11].mxu0  ;;  %v2232_v42 = vpop.f32.mrb[11].mxu1 }
 0x339   : > { %1242 = vst.msk [vmem:[%s3068_s12 + $0x20] sm:$0xff] %vm1237_vm6, %v2206_v36  ;;  %1250 = vst.msk [vmem:[%s3068_s12 + $0x60] sm:$0xff] %vm1237_vm6, %v2230_v37  ;;  %v2209_v43 = vadd.f32 %v2208_v41, %v2207_v38  ;;  %v2233_v44 = vadd.f32 %v2232_v42, %v2231_v40 }
 0x33b   : > { %1243 = vst.msk [vmem:[%s3068_s12 + $0x28] sm:$0xff] %vm1237_vm6, %v2209_v43  ;;  %1251 = vst.msk [vmem:[%s3068_s12 + $0x68] sm:$0xff] %vm1237_vm6, %v2233_v44 }
 0x33d   : > { %v2210_v45 = vpop.f32.mrb[12].mxu0  ;;  %v2234_v46 = vpop.f32.mrb[12].mxu1 }
 0x33e   : > { %v2211_v47 = vpop.f32.mrb[13].mxu0  ;;  %v2235_v48 = vpop.f32.mrb[13].mxu1 }
 0x33f   : > { %v2212_v49 = vadd.f32 %v2211_v47, %v2210_v45  ;;  %v2236_v50 = vadd.f32 %v2235_v48, %v2234_v46  ;;  %v2213_v51 = vpop.f32.mrb[14].mxu0  ;;  %v2237_v39 = vpop.f32.mrb[14].mxu1 }
 0x340   : > { %v2214_v52 = vpop.f32.mrb[15].mxu0  ;;  %v2238_v53 = vpop.f32.mrb[15].mxu1 }
 0x341   : > { %1244 = vst.msk [vmem:[%s3068_s12 + $0x30] sm:$0xff] %vm1237_vm6, %v2212_v49  ;;  %1252 = vst.msk [vmem:[%s3068_s12 + $0x70] sm:$0xff] %vm1237_vm6, %v2236_v50  ;;  %v2215_v54 = vadd.f32 %v2214_v52, %v2213_v51  ;;  %v2239_v55 = vadd.f32 %v2238_v53, %v2237_v39 }
 0x343   : > { %1245 = vst.msk [vmem:[%s3068_s12 + $0x38] sm:$0xff] %vm1237_vm6, %v2215_v54  ;;  %1253 = vst.msk [vmem:[%s3068_s12 + $0x78] sm:$0xff] %vm1237_vm6, %v2239_v55 }
 0x344 PF: > { %v1271_v56 = vld [vmem:[#allocation3] sm:$0xff]  ;;  %v1272_v57 = vld [vmem:[#allocation3 + $0x8] sm:$0xff]  ;;  %vm1275_vm7 = vcmask 261120   ;;  %v1273_v58 = vld [vmem:[#allocation3 + $0x10] sm:$0xff]  ;;  %s3105_s20 = scalar_lea.vmem [#allocation2], %s2873_s13  ;;  %s1484_s13 = scalar_lea.vmem (!%p2066_p2), [#allocation4], %s2869_s17 }
 0x345   : > { %v2431_v59 = vpack.c.bf16 %v1272_v57, %v1271_v56  ;;  %vm2432_vm8 = vmpackc.low %vm1275_vm7, %vm1275_vm7  ;;  %v1274_v60 = vld [vmem:[#allocation3 + $0x18] sm:$0xff] }
 0x346   : > { %v2437_v62 = vpack.c.bf16 %v1274_v60, %v1273_v58 }
 0x347   : > { %2433 = vmatprep.subr.msk.bf16.mxu0 %vm2432_vm8, %v2431_v59 }
 0x348   : > { %2436 = vmatpush3.bf16.xpose.msk.msra.mxu0 %vm2432_vm8, %v2431_v59 }
 0x349   : > { %2439 = vmatprep.subr.msk.bf16.mxu0 %vm2432_vm8, %v2437_v62 }
 0x34a   : > { %v1255_v61 = vld [vmem:[%s3105_s20] sm:$0xff]  ;;  %v1256_v63 = vld [vmem:[%s3105_s20 + $0x8] sm:$0xff]  ;;  %v1257_v0 = vld [vmem:[%s3105_s20 + $0x10] sm:$0xff] }
 0x34b   : > { %2337 = vmatprep.mubr.msk.f32.mxu0 %vm1275_vm7, %v1255_v61  ;;  %v1258_v1 = vld [vmem:[%s3105_s20 + $0x18] sm:$0xff]  ;;  %v1259_v2 = vld [vmem:[%s3105_s20 + $0x20] sm:$0xff]  ;;  %v1260_v3 = vld [vmem:[%s3105_s20 + $0x28] sm:$0xff] }
 0x34c   : > { %v1261_v4 = vld [vmem:[%s3105_s20 + $0x30] sm:$0xff]  ;;  %v1262_v5 = vld [vmem:[%s3105_s20 + $0x38] sm:$0xff]  ;;  %v1263_v6 = vld [vmem:[%s3105_s20 + $0x40] sm:$0xff] }
 0x34d   : > { %v1264_v7 = vld [vmem:[%s3105_s20 + $0x48] sm:$0xff]  ;;  %v1265_v8 = vld [vmem:[%s3105_s20 + $0x50] sm:$0xff]  ;;  %v1266_v9 = vld [vmem:[%s3105_s20 + $0x58] sm:$0xff] }
 0x34e   : > { %v1267_v10 = vld [vmem:[%s3105_s20 + $0x60] sm:$0xff]  ;;  %v1268_v11 = vld [vmem:[%s3105_s20 + $0x68] sm:$0xff]  ;;  %v1269_v12 = vld [vmem:[%s3105_s20 + $0x70] sm:$0xff] }
 0x34f   : > { %v1270_v13 = vld [vmem:[%s3105_s20 + $0x78] sm:$0xff] }
 0x350   : > { %2442 = vmatpush3.bf16.xpose.msk.msra.mxu0 %vm2432_vm8, %v2437_v62 }
 0x357   : > { %2338 = vmatmul.mubr.msk.f32.vlgmr.msra.gmra.mrb[0].mxu0 %vm1275_vm7, %v1256_v63 }
 0x358   : > { %2340 = vmatprep.mubr.msk.f32.mxu0 %vm1275_vm7, %v1257_v0 }
 0x35b   : > { %2341 = vmatmul.mubr.msk.f32.gmra.mrb[2].mxu0 %vm1275_vm7, %v1258_v1 }
 0x35c   : > { %2343 = vmatprep.mubr.msk.f32.mxu0 %vm1275_vm7, %v1259_v2 }
 0x35f   : > { %2344 = vmatmul.mubr.msk.f32.gmra.mrb[4].mxu0 %vm1275_vm7, %v1260_v3 }
 0x360   : > { %2346 = vmatprep.mubr.msk.f32.mxu0 %vm1275_vm7, %v1261_v4 }
 0x363   : > { %2347 = vmatmul.mubr.msk.f32.gmra.mrb[6].mxu0 %vm1275_vm7, %v1262_v5 }
 0x364   : > { %2349 = vmatprep.mubr.msk.f32.mxu0 %vm1275_vm7, %v1263_v6 }
 0x367   : > { %2350 = vmatmul.mubr.msk.f32.gmra.mrb[8].mxu0 %vm1275_vm7, %v1264_v7 }
 0x368   : > { %2352 = vmatprep.mubr.msk.f32.mxu0 %vm1275_vm7, %v1265_v8 }
 0x36b   : > { %2353 = vmatmul.mubr.msk.f32.gmra.mrb[10].mxu0 %vm1275_vm7, %v1266_v9 }
 0x36c   : > { %2355 = vmatprep.mubr.msk.f32.mxu0 %vm1275_vm7, %v1267_v10 }
 0x36f   : > { %2356 = vmatmul.mubr.msk.f32.gmra.mrb[12].mxu0 %vm1275_vm7, %v1268_v11 }
 0x370   : > { %2358 = vmatprep.mubr.msk.f32.mxu0 %vm1275_vm7, %v1269_v12 }
 0x373   : > { %2359 = vmatmul.mubr.msk.f32.gmra.mrb[14].mxu0 %vm1275_vm7, %v1270_v13 }
 0x42a   : > { %v2339_v14 = vpop.f32.mrb[0].mxu0 }
 0x42b   : > { %v1402_v15 = vpop.f32.mrb[1].mxu0  ;;  %1486 = vst.msk [vmem:[%s1484_s13 + $0x8] sm:$0xff] (!%p2066_p2), %vm1275_vm7, %v2339_v14 }
 0x42c   : > { %1485 = vst.msk [vmem:[%s1484_s13] sm:$0xff] (!%p2066_p2), %vm1275_vm7, %v1402_v15 }
 0x42e   : > { %v2342_v16 = vpop.f32.mrb[2].mxu0 }
 0x42f   : > { %v1412_v17 = vpop.f32.mrb[3].mxu0  ;;  %1488 = vst.msk [vmem:[%s1484_s13 + $0x18] sm:$0xff] (!%p2066_p2), %vm1275_vm7, %v2342_v16 }
 0x430   : > { %1487 = vst.msk [vmem:[%s1484_s13 + $0x10] sm:$0xff] (!%p2066_p2), %vm1275_vm7, %v1412_v17 }
 0x432   : > { %v2345_v18 = vpop.f32.mrb[4].mxu0 }
 0x433   : > { %v1422_v19 = vpop.f32.mrb[5].mxu0  ;;  %1490 = vst.msk [vmem:[%s1484_s13 + $0x28] sm:$0xff] (!%p2066_p2), %vm1275_vm7, %v2345_v18 }
 0x434   : > { %1489 = vst.msk [vmem:[%s1484_s13 + $0x20] sm:$0xff] (!%p2066_p2), %vm1275_vm7, %v1422_v19 }
 0x436   : > { %v3139_v20 = vpop.f32.mrb[6].mxu0 }
 0x437   : > { %v3141_v21 = vpop.f32.mrb[7].mxu0  ;;  %1492 = vst.msk [vmem:[%s1484_s13 + $0x38] sm:$0xff] (!%p2066_p2), %vm1275_vm7, %v3139_v20 }
 0x438   : > { %1491 = vst.msk [vmem:[%s1484_s13 + $0x30] sm:$0xff] (!%p2066_p2), %vm1275_vm7, %v3141_v21 }
 0x43a   : > { %v3143_v22 = vpop.f32.mrb[8].mxu0 }
 0x43b   : > { %v3145_v23 = vpop.f32.mrb[9].mxu0  ;;  %1494 = vst.msk [vmem:[%s1484_s13 + $0x48] sm:$0xff] (!%p2066_p2), %vm1275_vm7, %v3143_v22 }
 0x43c   : > { %1493 = vst.msk [vmem:[%s1484_s13 + $0x40] sm:$0xff] (!%p2066_p2), %vm1275_vm7, %v3145_v23 }
 0x43e   : > { %v3147_v24 = vpop.f32.mrb[10].mxu0 }
 0x43f   : > { %v3149_v25 = vpop.f32.mrb[11].mxu0  ;;  %1496 = vst.msk [vmem:[%s1484_s13 + $0x58] sm:$0xff] (!%p2066_p2), %vm1275_vm7, %v3147_v24 }
 0x440   : > { %1495 = vst.msk [vmem:[%s1484_s13 + $0x50] sm:$0xff] (!%p2066_p2), %vm1275_vm7, %v3149_v25 }
 0x441   : > { %1483 = sbr.rel (%p2066_p2) target bundleno = 1097 (0x449), region = 92 }
 0x442   : > { %v3151_v26 = vpop.f32.mrb[12].mxu0 }
 0x443   : > { %v3153_v27 = vpop.f32.mrb[13].mxu0  ;;  %1498 = vst.msk [vmem:[%s1484_s13 + $0x68] sm:$0xff] (!%p2066_p2), %vm1275_vm7, %v3151_v26 }
 0x444   : > { %1497 = vst.msk [vmem:[%s1484_s13 + $0x60] sm:$0xff] (!%p2066_p2), %vm1275_vm7, %v3153_v27 }
 0x446   : > { %v3155_v28 = vpop.f32.mrb[14].mxu0 }
 0x447   : > { %v3157_v29 = vpop.f32.mrb[15].mxu0  ;;  %1500 = vst.msk [vmem:[%s1484_s13 + $0x78] sm:$0xff] (!%p2066_p2), %vm1275_vm7, %v3155_v28 }
 0x448   : > { %1499 = vst.msk [vmem:[%s1484_s13 + $0x70] sm:$0xff] %vm1275_vm7, %v3157_v29 }
 0x449 PF: > { %v1535_v30 = vld [vmem:[%s2859_s18] sm:$0xff]  ;;  %v2720_v31 = vmov 0.0|0.0   ;;  %v1536_v32 = vld [vmem:[%s2859_s18 + $0x8] sm:$0xff]  ;;  %vm2721_vm9 = vmmov 0   ;;  %v2722_v33 = vmov 0.0   ;;  %s3192_s14 = scalar_lea.vmem [#allocation4], %s2869_s17 }
 0x44a   : > { %1551 = vxpose.xlu0.b32.start [1/16] (narrow) %v1535_v30, 8  ;;  %2443 = vmatprep.subr.bf16.mxu1 %v2720_v31  ;;  %v1537_v36 = vld [vmem:[%s2859_s18 + $0x10] sm:$0xff]  ;;  %v1538_v47 = vld [vmem:[%s2859_s18 + $0x18] sm:$0xff]  ;;  %v1539_v52 = vld [vmem:[%s2859_s18 + $0x20] sm:$0xff]  ;;  %p1655_p4 = scmp.eq.s32.totalorder %s2700_s21, 1  ;;  %p2138_p5 = scmp.ne.s32.totalorder %s2700_s21, 1 }
 0x44b   : > { %2393 = vmatprep.mubr.msk.f32.mxu1 %vm2721_vm9, %v2722_v33  ;;  %v1540_v58 = vld [vmem:[%s2859_s18 + $0x28] sm:$0xff]  ;;  %v1541_v0 = vld [vmem:[%s2859_s18 + $0x30] sm:$0xff]  ;;  %v1542_v6 = vld [vmem:[%s2859_s18 + $0x38] sm:$0xff]  ;;  %vm2724_vm10 = vmmov (!%p2138_p5), 0   ;;  %vm1743_vm11 = vcmask (!%p2138_p5), 1043456   ;;  %vm1739_vm12 = vcmask (!%p2138_p5), 31744  }
 0x44c   : > { %v1543_v12 = vld [vmem:[%s2859_s18 + $0x40] sm:$0xff]  ;;  %v1661_v30 = vld [vmem:[%s3326_s7 + $0x8] sm:$0xff] (!%p2138_p5)  ;;  %vm1818_vm13 = vcmask (!%p2138_p5), 130048  }
 0x44e   : > { %1552 = vxpose.xlu0.b32.cont [2/16] (narrow) %v1536_v32, 8  ;;  %v2723_v32 = vmov (!%p2138_p5), 0.0|0.0  }
 0x44f   : > { %v1502_v34 = vld [vmem:[%s3192_s14] sm:$0xff]  ;;  %v1503_v35 = vld [vmem:[%s3192_s14 + $0x8] sm:$0xff]  ;;  %v1504_v40 = vld [vmem:[%s3192_s14 + $0x10] sm:$0xff]  ;;  %2467 = vmatprep.subr.bf16.mxu0 (!%p2138_p5), %v2723_v32 }
 0x450   : > { %v1518_v37 = vmul.f32 %v1502_v34, %v1402_v15  ;;  %v1519_v38 = vmul.f32 %v2339_v14, %v1503_v35  ;;  %v1505_v41 = vld [vmem:[%s3192_s14 + $0x18] sm:$0xff]  ;;  %v1520_v42 = vmul.f32 %v1504_v40, %v1412_v17  ;;  %v1506_v44 = vld [vmem:[%s3192_s14 + $0x20] sm:$0xff]  ;;  %v1507_v45 = vld [vmem:[%s3192_s14 + $0x28] sm:$0xff]  ;;  %v2725_v35 = vmov (!%p2138_p5), 0.0  }
 0x451   : > { %v1521_v43 = vmul.f32 %v2342_v16, %v1505_v41  ;;  %v1522_v49 = vmul.f32 %v1506_v44, %v1422_v19  ;;  %v1523_v50 = vmul.f32 %v2345_v18, %v1507_v45  ;;  %v1508_v51 = vld [vmem:[%s3192_s14 + $0x30] sm:$0xff]  ;;  %v1509_v39 = vld [vmem:[%s3192_s14 + $0x38] sm:$0xff]  ;;  %v1510_v56 = vld [vmem:[%s3192_s14 + $0x40] sm:$0xff]  ;;  %2404 = vmatprep.mubr.msk.f32.mxu0 (!%p2138_p5), %vm2724_vm10, %v2725_v35 }
 0x452   : > { %v2444_v46 = vpack.c.bf16 %v1519_v38, %v1518_v37  ;;  %1553 = vxpose.xlu0.b32.cont [3/16] (narrow) %v1537_v36, 8  ;;  %v1524_v54 = vmul.f32 %v1508_v51, %v3141_v21  ;;  %v1525_v55 = vmul.f32 %v3139_v20, %v1509_v39  ;;  %v1511_v57 = vld [vmem:[%s3192_s14 + $0x48] sm:$0xff]  ;;  %v1526_v60 = vmul.f32 %v1510_v56, %v3145_v23  ;;  %v1512_v62 = vld [vmem:[%s3192_s14 + $0x50] sm:$0xff]  ;;  %v1513_v63 = vld [vmem:[%s3192_s14 + $0x58] sm:$0xff] }
 0x453   : > { %v2447_v48 = vpack.c.bf16 %v1521_v43, %v1520_v42  ;;  %v2450_v53 = vpack.c.bf16 %v1523_v50, %v1522_v49  ;;  %v1527_v61 = vmul.f32 %v3143_v22, %v1511_v57  ;;  %v1528_v2 = vmul.f32 %v1512_v62, %v3149_v25  ;;  %v1514_v4 = vld [vmem:[%s3192_s14 + $0x60] sm:$0xff]  ;;  %v1515_v5 = vld [vmem:[%s3192_s14 + $0x68] sm:$0xff]  ;;  %v1516_v10 = vld [vmem:[%s3192_s14 + $0x70] sm:$0xff] }
 0x454   : > { %2445 = vmatpush3.bf16.msra.mxu1 %v2444_v46  ;;  %v2453_v59 = vpack.c.bf16 %v1525_v55, %v1524_v54  ;;  %v1529_v3 = vmul.f32 %v3147_v24, %v1513_v63  ;;  %v1530_v8 = vmul.f32 %v1514_v4, %v3153_v27  ;;  %v1531_v9 = vmul.f32 %v3151_v26, %v1515_v5  ;;  %v1517_v11 = vld [vmem:[%s3192_s14 + $0x78] sm:$0xff]  ;;  %v1544_v16 = vld [vmem:[%s2859_s18 + $0x48] sm:$0xff]  ;;  %v1545_v18 = vld [vmem:[%s2859_s18 + $0x50] sm:$0xff] }
 0x455   : > { %2446 = vmatprep.subr.bf16.mxu1 %v2720_v31  ;;  %v2456_v1 = vpack.c.bf16 %v1527_v61, %v1526_v60  ;;  %v1532_v14 = vmul.f32 %v1516_v10, %v3157_v29  ;;  %v1533_v15 = vmul.f32 %v3155_v28, %v1517_v11  ;;  %v1546_v19 = vld [vmem:[%s2859_s18 + $0x58] sm:$0xff]  ;;  %v1547_v20 = vld [vmem:[%s2859_s18 + $0x60] sm:$0xff]  ;;  %v1548_v21 = vld [vmem:[%s2859_s18 + $0x68] sm:$0xff] }
 0x456   : > { %1554 = vxpose.xlu0.b32.cont [4/16] (narrow) %v1538_v47, 8  ;;  %v2459_v7 = vpack.c.bf16 %v1529_v3, %v1528_v2  ;;  %v2462_v13 = vpack.c.bf16 %v1531_v9, %v1530_v8  ;;  %v1549_v22 = vld [vmem:[%s2859_s18 + $0x70] sm:$0xff]  ;;  %v1550_v23 = vld [vmem:[%s2859_s18 + $0x78] sm:$0xff]  ;;  %v1534_v25 = vld [vmem:[#allocation5] sm:$0xff] }
 0x457   : > { %v2465_v17 = vpack.c.bf16 %v1533_v15, %v1532_v14  ;;  %v1660_v29 = vld [vmem:[%s3326_s7] sm:$0xff] (!%p2138_p5)  ;;  %v1663_v34 = vld [vmem:[%s3326_s7 + $0x18] sm:$0xff] (!%p2138_p5)  ;;  %v1737_v42 = vld [vmem:[#allocation6] sm:$0xff] (!%p2138_p5) }
 0x458   : > { %2448 = vmatpush3.bf16.msra.mxu1 %v2447_v48  ;;  %v2468_v33 = vpack.c.bf16 (!%p2138_p5), %v1661_v30, %v1660_v29  ;;  %v1738_v38 = vld [vmem:[%s2864_s28] sm:$0xf] (!%p2138_p5) }
 0x459   : > { %2449 = vmatprep.subr.bf16.mxu1 %v2720_v31 }
 0x45a   : > { %1555 = vxpose.xlu0.b32.cont [5/16] (narrow) %v1539_v52, 8  ;;  %2469 = vmatpush3.bf16.msra.mxu0 (!%p2138_p5), %v2468_v33 }
 0x45b   : > { %2470 = vmatprep.subr.bf16.mxu0 (!%p2138_p5), %v2723_v32 }
 0x45c   : > { %2451 = vmatpush3.bf16.msra.mxu1 %v2450_v53 }
 0x45d   : > { %2452 = vmatprep.subr.bf16.mxu1 %v2720_v31 }
 0x45e   : > { %1556 = vxpose.xlu0.b32.cont [6/16] (narrow) %v1540_v58, 8 }
 0x460   : > { %2454 = vmatpush3.bf16.msra.mxu1 %v2453_v59 }
 0x461   : > { %2455 = vmatprep.subr.bf16.mxu1 %v2720_v31 }
 0x462   : > { %1557 = vxpose.xlu0.b32.cont [7/16] (narrow) %v1541_v0, 8 }
 0x464   : > { %2457 = vmatpush3.bf16.msra.mxu1 %v2456_v1 }
 0x465   : > { %2458 = vmatprep.subr.bf16.mxu1 %v2720_v31 }
 0x466   : > { %1558 = vxpose.xlu0.b32.cont [8/16] (narrow) %v1542_v6, 8 }
 0x468   : > { %2460 = vmatpush3.bf16.msra.mxu1 %v2459_v7 }
 0x469   : > { %2461 = vmatprep.subr.bf16.mxu1 %v2720_v31 }
 0x46a   : > { %1559 = vxpose.xlu0.b32.cont [9/16] (narrow) %v1543_v12, 8 }
 0x46c   : > { %2463 = vmatpush3.bf16.msra.mxu1 %v2462_v13 }
 0x46d   : > { %2464 = vmatprep.subr.bf16.mxu1 %v2720_v31  ;;  %v1662_v31 = vld [vmem:[%s3326_s7 + $0x10] sm:$0xff] (!%p2138_p5) }
 0x46e   : > { %1560 = vxpose.xlu0.b32.cont [10/16] (narrow) %v1544_v16, 8  ;;  %v2471_v36 = vpack.c.bf16 (!%p2138_p5), %v1663_v34, %v1662_v31 }
 0x470   : > { %2466 = vmatpush3.bf16.msra.mxu1 %v2465_v17  ;;  %2472 = vmatpush3.bf16.msra.mxu0 (!%p2138_p5), %v2471_v36 }
 0x471   : > { %2407 = vmatprep.subr.mxu1 (!%p2138_p5), %v2725_v35 }
 0x472   : > { %1561 = vxpose.xlu0.b32.cont [11/16] (narrow) %v1545_v18, 8 }
 0x476   : > { %1562 = vxpose.xlu0.b32.cont [12/16] (narrow) %v1546_v19, 8 }
 0x47a   : > { %1563 = vxpose.xlu0.b32.cont [13/16] (narrow) %v1547_v20, 8 }
 0x47e   : > { %1564 = vxpose.xlu0.b32.cont [14/16] (narrow) %v1548_v21, 8 }
 0x482   : > { %1565 = vxpose.xlu0.b32.cont [15/16] (narrow) %v1549_v22, 8 }
 0x486   : > { %1566 = vxpose.xlu0.b32.end [16/16] (narrow) %v1550_v23, 8 }
 0x4ca   : > { %v1567_v24 = vpop.trf.xlu0 }
 0x4cb   : > { %2394 = vmatmul.mubr.f32.vlgmr.msra.gmra.mrb[0].mxu1 %v1567_v24 }
 0x4cc   : > { %2409 = vmatprep.mubr.msk.f32.mxu1 (!%p2138_p5), %vm2724_vm10, %v2725_v35  ;;  %2408 = vmatpush3.msk.msra.mxu1 (!%p2138_p5), %vm1743_vm11, %v1738_v38 }
 0x59b   : > { %1658 = sbr.rel (%p2138_p5) target bundleno = 1876 (0x754), region = 96 }
 0x59e   : > { %v1649_v26 = vpop.f32.mrb[0].mxu1 }
 0x59f   : > { %v1653_v27 = vadd.f32 %v1649_v26, %v1534_v25  ;;  %v2395_v28 = vpop.f32.mrb[1].mxu1 }
 0x5a1   : > { %1654 = vst.msk [vmem:[#allocation5] sm:$0xff] %vm1275_vm7, %v1653_v27 }
 0x5a8   : > { %v1659_v37 = vld [vmem:[#allocation5] sm:$0xff] }
 0x5a9   : > { %2405 = vmatmul.mubr.msk.f32.vlgmr.msra.gmra.mrb[0].mxu0 %vm1275_vm7, %v1659_v37 }
 0x67c   : > { %v1733_v40 = vpop.f32.mrb[0].mxu0 }
 0x67d   : > { %v2406_v41 = vpop.f32.mrb[1].mxu0  ;;  %2410 = vmatmul.mubr.msk.f32.vlgmr.msra.gmra.mrb[0].mxu1 %vm1739_vm12, %v1733_v40 }
 0x750   : > { %v1813_v43 = vpop.f32.mrb[0].mxu1 }
 0x751   : > { %v1817_v44 = vadd.f32 %v1813_v43, %v1737_v42  ;;  %v2411_v45 = vpop.f32.mrb[1].mxu1 }
 0x753   : > { %1819 = vst.msk [vmem:[#allocation6] sm:$0xff] %vm1818_vm13, %v1817_v44 }
 0x754 PF: > { %p1820_p6 = scmp.eq.s32.totalorder %s2704_s22, 2 }
 0x756   : > { %p1821_p7 = pnand %p1820_p6, %p1655_p4 }
 0x757   : > { %v1835_v46 = vld [vmem:[%s3329_s10] sm:$0xff] (!%p1821_p7)  ;;  %v1836_v47 = vld [vmem:[%s3329_s10 + $0x8] sm:$0xff] (!%p1821_p7)  ;;  %v2726_v49 = vmov (!%p1821_p7), 0.0|0.0   ;;  %vm2727_vm14 = vmmov (!%p1821_p7), 0   ;;  %v2728_v51 = vmov (!%p1821_p7), 0.0   ;;  %vm1844_vm15 = vcmask (!%p1821_p7), 130048  }
 0x758   : > { %1824 = sbr.rel (%p1821_p7) target bundleno = 2420 (0x974), region = 100  ;;  %2473 = vmatprep.subr.bf16.mxu0 (!%p1821_p7), %v2726_v49  ;;  %v2474_v50 = vpack.c.bf16 (!%p1821_p7), %v1836_v47, %v1835_v46  ;;  %2416 = vmatprep.mubr.msk.f32.mxu0 (!%p1821_p7), %vm2727_vm14, %v2728_v51  ;;  %v2142_v39 = vld [vmem:[%s3328_s9] ss:$0 sm:$0xff] (!%p1821_p7)  ;;  %vm1918_vm0 = vcmask (!%p1821_p7), 39936  }
 0x759   : > { %v2143_v54 = vld [vmem:[%s3330_s11] ss:$0 sm:$0xff] (!%p1821_p7) }
 0x75a   : > { %v1825_v48 = vld [vmem:[#allocation6] sm:$0xff] (!%p1821_p7)  ;;  %2475 = vmatpush3.bf16.msra.mxu0 (!%p1821_p7), %v2474_v50 }
 0x75b   : > { %v1833_v52 = vadd.f32 (!%p1821_p7), %v2142_v39, %v1825_v48 }
 0x75d   : > { %v1834_v53 = vmax.f32 (!%p1821_p7), %v1833_v52, 0.0 }
 0x75f   : > { %2417 = vmatmul.mubr.msk.f32.vlgmr.msra.gmra.mrb[0].mxu0 %vm1844_vm15, %v1834_v53 }
 0x832   : > { %v1914_v55 = vpop.f32.mrb[0].mxu0 }
 0x833   : > { %v1915_v56 = vadd.f32 %v2143_v54, %v1914_v55  ;;  %v2418_v57 = vpop.f32.mrb[1].mxu0 }
 0x835   : > { %v1919_v58 = vsel %vm1918_vm0, %v1915_v56, -inf }
 0x836   : > { %1920 = vmax.xlane.f32.xlu0 %v1919_v58 }
 0x8c3   : > { %v1921_v59 = vpop.xlane.xlu0 %1920 }
 0x8c4   : > { %v1922_v60 = vsub.f32 %v1915_v56, %v1921_v59 }
 0x8c6   : > { %v1923_v61 = vmul.f32 1.442695, %v1922_v60 }
 0x8c8   : > { %2644 = vpow2.f32 %v1923_v61 }
 0x8d2   : > { %v2645_v62 = vpop.eup %2644 }
 0x8d3   : > { %v1925_v63 = vsel %vm1918_vm0, %v2645_v62, 0.0 }
 0x8d4   : > { %1926 = vadd.xlane.f32.xlu0 %v1925_v63 }
 0x961   : > { %v1927_v0 = vpop.xlane.xlu0 %1926 }
 0x962   : > { %2646 = vlog2.f32 %v1927_v0 }
 0x96c   : > { %v2647_v1 = vpop.eup %2646 }
 0x96d   : > { %v1929_v2 = vmul.f32 0.6931472, %v2647_v1 }
 0x96f   : > { %v1930_v3 = vadd.f32 %v1929_v2, %v1921_v59 }
 0x971   : > { %v1931_v4 = vsub.f32 %v1915_v56, %v1930_v3 }
 0x973   : > { %1932 = vst.msk [vmem:[#allocation7] sm:$0xff] %vm1918_vm0, %v1931_v4 }
 0x974 PF: > { %s3342_s20 = sld [smem:[#allocation12_spill]]  ;;  %s2729_s17 = smov [#allocation7]  }
 0x975   : > { %s1940_s16 = sshll.u32 %s2729_s17, 4  ;;  %s1941_s16 = int_to_ptr.vmem [resolvable:$true] %s1940_s16 }
 0x976   : > { %s2648_s15 = scalar_lea.vmem %s1941_s16, 128  ;;  %p2655_p12 = scmp.lt.s32.totalorder %s1941_s16, %s1941_s16 }
 0x977   : > { %p2649_p9 = scmp.ne.s32.totalorder %s1941_s16, %s2648_s15  ;;  %p2656_p13 = scmp.lt.s32.totalorder %s2648_s15, %s2648_s15 }
 0x979   : > { %p2657_p0 = por %p2656_p13, %p2655_p12 }
 0x97a   : > { %s3343_s13 = sadd.s32 4294967295, %s3342_s20  }
 0x97b   : > { %p3278_p8 = scmp.eq.s32.totalorder %s3343_s13, 5 }
 0x97d   : > { %p2650_p10 = pnand %p2649_p9, %p3278_p8 }
 0x97f   : > { %p2651_p11 = pneg %p2650_p10 }
 0x981   : > { %p2658_p1 = pnand %p2657_p0, %p2651_p11 }
 0x983   : > { %2661 = shalt.err (!%p2658_p1)
}
 0x984   : > { %s3345_s26 = sld [smem:[#allocation15_spill]] }
 0x98a   : > { %s2662_s29 = scalar_lea.hbm %s3345_s26, 128 }
 0x98b   : > { %p2663_p2 = scmp.ne.s32.totalorder %s3345_s26, %s2662_s29  ;;  %p2668_p5 = scmp.lt.u32.totalorder %s2662_s29, %s3345_s26 }
 0x98d   : > { %p2664_p3 = pnand %p2663_p2, %p3278_p8 }
 0x98f   : > { %p2665_p4 = pneg %p2664_p3 }
 0x991   : > { %p2670_p6 = pnand %p2668_p5, %p2665_p4 }
 0x993   : > { %2673 = shalt.err (!%p2670_p6)
}
 0x994   : > { %2499 = dma.vmem_to_hbm [thread:$0]  (%p3278_p8), %s1941_s16, 128, %s3345_s26, [#allocation8]  }
 0x995   : > { %2695 = dma.done.wait (%p3278_p8), [#allocation8], 128  }
 0x996   : > { %2697 = vsyncadd (%p3278_p8), [#allocation8], 4294967168 }
 0x997 PF: > { %s3346_s22 = sld [smem:[#allocation12_spill]]  ;;  %s3347_s21 = sld [smem:[#allocation10_spill]] }
 0x998   : > { %s3349_s23 = sld [smem:[#allocation13_spill]]  ;;  %s3350_s24 = sld [smem:[#allocation14_spill]] }
 0x99d   : > { %s23_s25 = sadd.s32 1, %s3346_s22   ;;  %s3348_s22 = sld [smem:[#allocation11_spill]] }
 0x99e   : > { %p20_p7 = scmp.ge.s32.totalorder %s23_s25, 8  }
 0x9a0   :  { %22 = sbr.rel (!%p20_p7) target bundleno = 5 (0x5), region = 142 }
 0x9a7   :  { %1953 = vsyncpa [#allocation8], 1 }
 0x9a8   :  { %1955 = vsyncpa [#allocation8 + $0x1], 1 }

</bundles_post_ra>
